<compile_context>
chip_gen: v7x
topology: tpu7x:2x2x1
jax: 0.10.0
libtpu: 0.0.40
codegen_flags: <defaults>
</compile_context>

<pallas_src>
import numpy as np
import jax
import jax.numpy as jnp
from jax.experimental import pallas as pl
from jax.experimental.pallas import tpu as pltpu

EPS = 1e-5


def _band_weight(w_hwio, w_out, pad):
    """Pack an HWIO conv weight into KH block-banded (Toeplitz-in-W) matrices.

    Returns T of shape (KH, (w_out+2*pad)*Ci, w_out*Co) such that, with `prow[r]` the
    zero-padded input row r flattened as lane = w_in*Ci + ci,
        conv_out[row] = sum_kh  prow[row + kh] @ T[kh]          (lane = w*Co + co).
    """
    KH, KW, Ci, Co = w_hwio.shape
    w_in = w_out + 2 * pad
    # sel[kw, a, b] = 1  iff  a (padded input col) == b (output col) + kw
    sel = (np.arange(w_in)[None, :, None]
           == np.arange(w_out)[None, None, :] + np.arange(KW)[:, None, None])
    sel = jnp.asarray(sel.astype(np.float32))
    t = jnp.einsum('kab,hkic->haibc', sel, w_hwio.astype(jnp.float32))
    return t.reshape(KH, w_in * Ci, w_out * Co)


def _channel_reduce_matrix(c, w, cnt):
    """(W*C, W*C) matrix M with M[wi*C+ci, wo*C+co] = (ci==co)/cnt.

    (row_sums @ M) gives the per-channel batch mean already tiled across W (lane-dense),
    so BN stats never materialize as narrow (1,C) vectors.
    """
    return jnp.asarray(np.tile(np.eye(c, dtype=np.float32), (w, w)) / cnt)


def _make_kernel(N, H, W, Cin, Cout):
    WCi, WCo = W * Cin, W * Cout

    def kernel(x_ref, t1_ref, t2_ref, tid_ref, m1_ref, m2_ref, p_ref, o_ref,
               padx_ref, pad1_ref, pad2_ref):
        f32 = jnp.float32
        x = x_ref[...]                                           # (N, H, W*Cin) f32

        # ---- identity-path input: zero-pad x by 2 (one dense zero + one dense write) ----
        padx_ref[...] = jnp.zeros(padx_ref.shape, f32)
        padx_ref[:, 2:H + 2, 2 * Cin:(W + 2) * Cin] = x

        # ---- BN1 (training-mode batch stats, two-pass) + ReLU at 64-lane width ----
        m1 = m1_ref[...]                                         # (WCi, WCi), 1/cnt folded
        g1 = p_ref[0:1, 0:WCi]
        b1 = p_ref[1:2, 0:WCi]
        s1 = jnp.sum(x, axis=(0, 1), keepdims=True).reshape(1, WCi)
        mean1 = jnp.dot(s1, m1, preferred_element_type=f32)      # per-channel mean, W-tiled
        xc = x - mean1
        q1 = jnp.sum(xc * xc, axis=(0, 1), keepdims=True).reshape(1, WCi)
        var1 = jnp.dot(q1, m1, preferred_element_type=f32)       # biased batch var, W-tiled
        h1 = jnp.maximum(xc * (g1 * jax.lax.rsqrt(var1 + EPS)) + b1, 0.0)   # (N, H, WCi)

        # ---- pad h1 by 1; conv1 = 3 row-shifted lane-dense band matmuls ----
        pad1_ref[...] = jnp.zeros(pad1_ref.shape, f32)
        pad1_ref[:, 1:H + 1, Cin:(W + 1) * Cin] = h1

        def band_conv(src_ref, t_ref):
            # sum_kh  src[:, kh:kh+H, :].reshape(NH, Win*C) @ T[kh]   ->  (N*H, W*Cout) f32
            acc = None
            for kh in range(t_ref.shape[0]):
                lhs = src_ref[:, kh:kh + H, :].reshape(N * H, src_ref.shape[-1])
                d = jnp.dot(lhs.astype(t_ref.dtype), t_ref[kh],
                            preferred_element_type=f32)
                acc = d if acc is None else acc + d
            return acc

        acc1 = band_conv(pad1_ref, t1_ref)                       # conv1 -> (N*H, W*Cout)

        # ---- BN2 (batch stats, two-pass) + ReLU at 128-lane width ----
        m2 = m2_ref[...]
        g2 = p_ref[2:3, 0:WCo]
        b2 = p_ref[3:4, 0:WCo]
        s2 = jnp.sum(acc1, axis=0, keepdims=True)                # (1, WCo)
        mean2 = jnp.dot(s2, m2, preferred_element_type=f32)
        ac = acc1 - mean2
        q2 = jnp.sum(ac * ac, axis=0, keepdims=True)
        var2 = jnp.dot(q2, m2, preferred_element_type=f32)
        h2 = jnp.maximum(ac * (g2 * jax.lax.rsqrt(var2 + EPS)) + b2, 0.0)   # (N*H, WCo)

        # ---- pad h2 by 1; conv2 (3 band dots) + identity conv (5 band dots) ----
        pad2_ref[...] = jnp.zeros(pad2_ref.shape, f32)
        pad2_ref[:, 1:H + 1, Cout:(W + 1) * Cout] = h2.reshape(N, H, WCo)

        out = band_conv(pad2_ref, t2_ref) + band_conv(padx_ref, tid_ref)
        o_ref[...] = out                                         # dense (N*H, W*Cout) store

    return kernel


def resnet_block_pallas(x_nchw, w1, w2, wid, g1, b1, g2, b2, *, mxu_dtype=jnp.float32):
    """x_nchw: (N, Cin, H, W). Conv weights in HWIO. Returns (N, Cout, H, W)."""
    N, Cin, H, W = x_nchw.shape
    Cout = w1.shape[-1]
    WCi, WCo = W * Cin, W * Cout
    cnt = float(N * H * W)

    # Lane-dense activation layout: (N, H, W*Cin); kernel output is (N*H, W*Cout).
    x3d = jnp.transpose(x_nchw, (0, 2, 3, 1)).astype(jnp.float32).reshape(N, H, WCi)

    # Host-side packing: block-banded conv weights in the MXU operand dtype, 1/cnt-folded
    # channel-selection matrices, and W-tiled BN gamma/beta folded into one small upload.
    t1 = _band_weight(w1, W, 1).astype(mxu_dtype)    # (3, (W+2)*Cin,  W*Cout)
    t2 = _band_weight(w2, W, 1).astype(mxu_dtype)    # (3, (W+2)*Cout, W*Cout)
    tid = _band_weight(wid, W, 2).astype(mxu_dtype)  # (5, (W+4)*Cin,  W*Cout)
    m1 = _channel_reduce_matrix(Cin, W, cnt)         # (WCi, WCi) f32
    m2 = _channel_reduce_matrix(Cout, W, cnt)        # (WCo, WCo) f32
    pw = W * max(Cin, Cout)
    params = jnp.zeros((4, pw), jnp.float32)
    params = params.at[0, :WCi].set(jnp.tile(g1.astype(jnp.float32), W))
    params = params.at[1, :WCi].set(jnp.tile(b1.astype(jnp.float32), W))
    params = params.at[2, :WCo].set(jnp.tile(g2.astype(jnp.float32), W))
    params = params.at[3, :WCo].set(jnp.tile(b2.astype(jnp.float32), W))

    out2d = pl.pallas_call(
        _make_kernel(N, H, W, Cin, Cout),
        out_shape=jax.ShapeDtypeStruct((N * H, WCo), jnp.float32),   # lane-dense output
        in_specs=[pl.BlockSpec(memory_space=pltpu.MemorySpace.VMEM)] * 7,
        out_specs=pl.BlockSpec(memory_space=pltpu.MemorySpace.VMEM),
        scratch_shapes=[
            pltpu.VMEM((N, H + 4, (W + 4) * Cin), jnp.float32),   # x zero-padded by 2
            pltpu.VMEM((N, H + 2, (W + 2) * Cin), jnp.float32),   # relu(bn1(x)) padded by 1
            pltpu.VMEM((N, H + 2, (W + 2) * Cout), jnp.float32),  # relu(bn2(conv1)) padded by 1
        ],
        # Resident footprint (lane-padded, f32 worst case) is < 1 MiB; 32 MiB is safe on
        # every generation including v7x's 64 MiB physical VMEM.
        compiler_params=pltpu.CompilerParams(vmem_limit_bytes=32 * 1024 * 1024),
    )(x3d, t1, t2, tid, m1, m2, params)

    # (N*H, W*Cout) -> (N, H, W, Cout) is a free row-major re-view; then back to NCHW.
    return jnp.transpose(out2d.reshape(N, H, W, Cout), (0, 3, 1, 2))


def resnet_block_reference(x_nchw, w1, w2, wid, g1, b1, g2, b2):
    """Pure-JAX reference (XLA convs), same semantics, for validation."""
    def bn(x, g, b):
        mean = x.mean(axis=(0, 2, 3), keepdims=True)
        var = ((x - mean) ** 2).mean(axis=(0, 2, 3), keepdims=True)
        return (x - mean) * jax.lax.rsqrt(var + EPS) * g.reshape(1, -1, 1, 1) \
            + b.reshape(1, -1, 1, 1)

    def conv(x, w, pad):
        return jax.lax.conv_general_dilated(
            x, w, window_strides=(1, 1), padding=[(pad, pad), (pad, pad)],
            dimension_numbers=('NCHW', 'HWIO', 'NCHW'))

    out = jnp.maximum(bn(x_nchw, g1, b1), 0.0)
    out = conv(out, w1, 1)
    out = jnp.maximum(bn(out, g2, b2), 0.0)
    out = conv(out, w2, 1)
    identity = conv(x_nchw, wid, 2)
    return out + identity


if __name__ == "__main__":
    key = jax.random.PRNGKey(0)
    N, Cin, Cout, H, W = 2, 4, 8, 16, 16

    ks = jax.random.split(key, 8)
    x = jax.random.normal(ks[0], (N, Cin, H, W), jnp.float32)
    # Deterministic synthetic parameters (PyTorch module shapes, HWIO layout):
    w1 = 0.1 * jax.random.normal(ks[1], (3, 3, Cin, Cout), jnp.float32)   # conv1
    w2 = 0.1 * jax.random.normal(ks[2], (3, 3, Cout, Cout), jnp.float32)  # conv2
    wid = 0.1 * jax.random.normal(ks[3], (5, 5, Cin, Cout), jnp.float32)  # identity_conv
    g1 = 1.0 + 0.1 * jax.random.normal(ks[4], (Cin,), jnp.float32)        # bn1 weight
    b1 = 0.1 * jax.random.normal(ks[5], (Cin,), jnp.float32)              # bn1 bias
    g2 = 1.0 + 0.1 * jax.random.normal(ks[6], (Cout,), jnp.float32)       # bn2 weight
    b2 = 0.1 * jax.random.normal(ks[7], (Cout,), jnp.float32)             # bn2 bias

    ref = jax.block_until_ready(resnet_block_reference(x, w1, w2, wid, g1, b1, g2, b2))

    # f32 MXU operands: strict check against the f32 XLA reference.
    out_f32 = jax.block_until_ready(
        resnet_block_pallas(x, w1, w2, wid, g1, b1, g2, b2, mxu_dtype=jnp.float32))
    assert out_f32.shape == (N, Cout, H, W), out_f32.shape
    np.testing.assert_allclose(np.asarray(out_f32), np.asarray(ref), atol=1e-3, rtol=1e-3)

    # bf16 MXU operands with f32 accumulation: the scaling configuration from the review.
    # Tolerance reflects bf16 operand rounding (~2^-8 relative per operand across K<=100
    # accumulated taps), not an algorithmic difference.
    out_bf16 = jax.block_until_ready(
        resnet_block_pallas(x, w1, w2, wid, g1, b1, g2, b2, mxu_dtype=jnp.bfloat16))
    np.testing.assert_allclose(np.asarray(out_bf16), np.asarray(ref), atol=5e-2, rtol=5e-2)

    print("KERNEL_OK")
</pallas_src>

<mosaic_0001>
module attributes {stable_mosaic.version = 11 : i64} {
  func.func @kernel(%arg0: memref<2x16x64xf32, #tpu.memory_space<vmem>>, %arg1: memref<3x72x128xf32, #tpu.memory_space<vmem>>, %arg2: memref<3x144x128xf32, #tpu.memory_space<vmem>>, %arg3: memref<5x80x128xf32, #tpu.memory_space<vmem>>, %arg4: memref<64x64xf32, #tpu.memory_space<vmem>>, %arg5: memref<128x128xf32, #tpu.memory_space<vmem>>, %arg6: memref<4x128xf32, #tpu.memory_space<vmem>>, %arg7: memref<32x128xf32, #tpu.memory_space<vmem>>, %arg8: memref<2x20x80xf32, #tpu.memory_space<vmem>>, %arg9: memref<2x18x72xf32, #tpu.memory_space<vmem>>, %arg10: memref<2x18x144xf32, #tpu.memory_space<vmem>>) attributes {dimension_semantics = [], scalar_prefetch = 0 : i64, scratch_operands = 3 : i64, tpu.core_type = #tpu.core_type<tc>} {
    %c0 = arith.constant 0 : index
    %c0_0 = arith.constant 0 : index
    %c0_1 = arith.constant 0 : index
    %0 = vector.load %arg0[%c0, %c0_0, %c0_1] : memref<2x16x64xf32, #tpu.memory_space<vmem>>, vector<2x16x64xf32>
    %cst = arith.constant 0.000000e+00 : f32
    %1 = vector.broadcast %cst : f32 to vector<2x20x80xf32>
    %c0_2 = arith.constant 0 : index
    %c0_3 = arith.constant 0 : index
    %c0_4 = arith.constant 0 : index
    %2 = vector.load %arg8[%c0_2, %c0_3, %c0_4] : memref<2x20x80xf32, #tpu.memory_space<vmem>>, vector<2x20x80xf32>
    tpu.vector_store %arg8[%c0_2, %c0_3, %c0_4], %1 {strides = array<i32>} : memref<2x20x80xf32, #tpu.memory_space<vmem>>, vector<2x20x80xf32>,
    %c0_5 = arith.constant 0 : index
    %c2 = arith.constant 2 : index
    %c8 = arith.constant 8 : index
    %3 = vector.load %arg8[%c0_5, %c2, %c8] : memref<2x20x80xf32, #tpu.memory_space<vmem>>, vector<2x16x64xf32>
    tpu.vector_store %arg8[%c0_5, %c2, %c8], %0 {strides = array<i32>} : memref<2x20x80xf32, #tpu.memory_space<vmem>>, vector<2x16x64xf32>,
    %c0_6 = arith.constant 0 : index
    %c0_7 = arith.constant 0 : index
    %4 = vector.load %arg4[%c0_6, %c0_7] : memref<64x64xf32, #tpu.memory_space<vmem>>, vector<64x64xf32>
    %c0_8 = arith.constant 0 : index
    %c0_9 = arith.constant 0 : index
    %5 = vector.load %arg6[%c0_8, %c0_9] : memref<4x128xf32, #tpu.memory_space<vmem>>, vector<1x64xf32>
    %c1 = arith.constant 1 : index
    %c0_10 = arith.constant 0 : index
    %6 = vector.load %arg6[%c1, %c0_10] : memref<4x128xf32, #tpu.memory_space<vmem>>, vector<1x64xf32>
    %cst_11 = arith.constant dense<0.000000e+00> : vector<64xf32>
    %7 = vector.multi_reduction <add>, %0, %cst_11 [0, 1] : vector<2x16x64xf32> to vector<64xf32>
    %8 = vector.shape_cast %7 : vector<64xf32> to vector<1x1x64xf32>
    %9 = vector.shape_cast %8 : vector<1x1x64xf32> to vector<1x64xf32>
    %cst_12 = arith.constant dense<0.000000e+00> : vector<1x64xf32>
    %10 = tpu.matmul %9, %4, %cst_12 {dimension_numbers = #tpu.dot_dimension_numbers<[1], [0], [0], [1], [0, 0, 1, 1], [], []>} : vector<1x64xf32>, vector<64x64xf32>, vector<1x64xf32> -> vector<1x64xf32>
    %11 = vector.shape_cast %10 : vector<1x64xf32> to vector<1x1x64xf32>
    %12 = vector.broadcast %11 : vector<1x1x64xf32> to vector<2x16x64xf32>
    %13 = arith.subf %0, %12 : vector<2x16x64xf32>
    %14 = arith.mulf %13, %13 : vector<2x16x64xf32>
    %cst_13 = arith.constant dense<0.000000e+00> : vector<64xf32>
    %15 = vector.multi_reduction <add>, %14, %cst_13 [0, 1] : vector<2x16x64xf32> to vector<64xf32>
    %16 = vector.shape_cast %15 : vector<64xf32> to vector<1x1x64xf32>
    %17 = vector.shape_cast %16 : vector<1x1x64xf32> to vector<1x64xf32>
    %cst_14 = arith.constant dense<0.000000e+00> : vector<1x64xf32>
    %18 = tpu.matmul %17, %4, %cst_14 {dimension_numbers = #tpu.dot_dimension_numbers<[1], [0], [0], [1], [0, 0, 1, 1], [], []>} : vector<1x64xf32>, vector<64x64xf32>, vector<1x64xf32> -> vector<1x64xf32>
    %cst_15 = arith.constant 9.99999974E-6 : f32
    %19 = vector.broadcast %cst_15 : f32 to vector<1x64xf32>
    %20 = arith.addf %18, %19 : vector<1x64xf32>
    %21 = math.rsqrt %20 : vector<1x64xf32>
    %22 = arith.mulf %5, %21 : vector<1x64xf32>
    %23 = vector.shape_cast %22 : vector<1x64xf32> to vector<1x1x64xf32>
    %24 = vector.broadcast %23 : vector<1x1x64xf32> to vector<2x16x64xf32>
    %25 = arith.mulf %13, %24 : vector<2x16x64xf32>
    %26 = vector.shape_cast %6 : vector<1x64xf32> to vector<1x1x64xf32>
    %27 = vector.broadcast %26 : vector<1x1x64xf32> to vector<2x16x64xf32>
    %28 = arith.addf %25, %27 : vector<2x16x64xf32>
    %cst_16 = arith.constant 0.000000e+00 : f32
    %29 = vector.broadcast %cst_16 : f32 to vector<2x16x64xf32>
    %30 = arith.maximumf %28, %29 : vector<2x16x64xf32>
    %cst_17 = arith.constant 0.000000e+00 : f32
    %31 = vector.broadcast %cst_17 : f32 to vector<2x18x72xf32>
    %c0_18 = arith.constant 0 : index
    %c0_19 = arith.constant 0 : index
    %c0_20 = arith.constant 0 : index
    %32 = vector.load %arg9[%c0_18, %c0_19, %c0_20] : memref<2x18x72xf32, #tpu.memory_space<vmem>>, vector<2x18x72xf32>
    tpu.vector_store %arg9[%c0_18, %c0_19, %c0_20], %31 {strides = array<i32>} : memref<2x18x72xf32, #tpu.memory_space<vmem>>, vector<2x18x72xf32>,
    %c0_21 = arith.constant 0 : index
    %c1_22 = arith.constant 1 : index
    %c4 = arith.constant 4 : index
    %33 = vector.load %arg9[%c0_21, %c1_22, %c4] : memref<2x18x72xf32, #tpu.memory_space<vmem>>, vector<2x16x64xf32>
    tpu.vector_store %arg9[%c0_21, %c1_22, %c4], %30 {strides = array<i32>} : memref<2x18x72xf32, #tpu.memory_space<vmem>>, vector<2x16x64xf32>,
    %c0_23 = arith.constant 0 : index
    %c0_24 = arith.constant 0 : index
    %c0_25 = arith.constant 0 : index
    %34 = vector.load %arg9[%c0_23, %c0_24, %c0_25] : memref<2x18x72xf32, #tpu.memory_space<vmem>>, vector<2x16x72xf32>
    %35 = vector.shape_cast %34 : vector<2x16x72xf32> to vector<32x72xf32>
    %c0_26 = arith.constant 0 : index
    %c0_27 = arith.constant 0 : index
    %c0_28 = arith.constant 0 : index
    %36 = vector.load %arg1[%c0_26, %c0_27, %c0_28] : memref<3x72x128xf32, #tpu.memory_space<vmem>>, vector<1x72x128xf32>
    %37 = vector.shape_cast %36 : vector<1x72x128xf32> to vector<72x128xf32>
    %cst_29 = arith.constant dense<0.000000e+00> : vector<32x128xf32>
    %38 = tpu.matmul %35, %37, %cst_29 {dimension_numbers = #tpu.dot_dimension_numbers<[1], [0], [0], [1], [0, 0, 1, 1], [], []>} : vector<32x72xf32>, vector<72x128xf32>, vector<32x128xf32> -> vector<32x128xf32>
    %c0_30 = arith.constant 0 : index
    %c1_31 = arith.constant 1 : index
    %c0_32 = arith.constant 0 : index
    %39 = vector.load %arg9[%c0_30, %c1_31, %c0_32] : memref<2x18x72xf32, #tpu.memory_space<vmem>>, vector<2x16x72xf32>
    %40 = vector.shape_cast %39 : vector<2x16x72xf32> to vector<32x72xf32>
    %c1_33 = arith.constant 1 : index
    %c0_34 = arith.constant 0 : index
    %c0_35 = arith.constant 0 : index
    %41 = vector.load %arg1[%c1_33, %c0_34, %c0_35] : memref<3x72x128xf32, #tpu.memory_space<vmem>>, vector<1x72x128xf32>
    %42 = vector.shape_cast %41 : vector<1x72x128xf32> to vector<72x128xf32>
    %cst_36 = arith.constant dense<0.000000e+00> : vector<32x128xf32>
    %43 = tpu.matmul %40, %42, %cst_36 {dimension_numbers = #tpu.dot_dimension_numbers<[1], [0], [0], [1], [0, 0, 1, 1], [], []>} : vector<32x72xf32>, vector<72x128xf32>, vector<32x128xf32> -> vector<32x128xf32>
    %44 = arith.addf %38, %43 : vector<32x128xf32>
    %c0_37 = arith.constant 0 : index
    %c2_38 = arith.constant 2 : index
    %c0_39 = arith.constant 0 : index
    %45 = vector.load %arg9[%c0_37, %c2_38, %c0_39] : memref<2x18x72xf32, #tpu.memory_space<vmem>>, vector<2x16x72xf32>
    %46 = vector.shape_cast %45 : vector<2x16x72xf32> to vector<32x72xf32>
    %c2_40 = arith.constant 2 : index
    %c0_41 = arith.constant 0 : index
    %c0_42 = arith.constant 0 : index
    %47 = vector.load %arg1[%c2_40, %c0_41, %c0_42] : memref<3x72x128xf32, #tpu.memory_space<vmem>>, vector<1x72x128xf32>
    %48 = vector.shape_cast %47 : vector<1x72x128xf32> to vector<72x128xf32>
    %cst_43 = arith.constant dense<0.000000e+00> : vector<32x128xf32>
    %49 = tpu.matmul %46, %48, %cst_43 {dimension_numbers = #tpu.dot_dimension_numbers<[1], [0], [0], [1], [0, 0, 1, 1], [], []>} : vector<32x72xf32>, vector<72x128xf32>, vector<32x128xf32> -> vector<32x128xf32>
    %50 = arith.addf %44, %49 : vector<32x128xf32>
    %c0_44 = arith.constant 0 : index
    %c0_45 = arith.constant 0 : index
    %51 = vector.load %arg5[%c0_44, %c0_45] : memref<128x128xf32, #tpu.memory_space<vmem>>, vector<128x128xf32>
    %c2_46 = arith.constant 2 : index
    %c0_47 = arith.constant 0 : index
    %52 = vector.load %arg6[%c2_46, %c0_47] : memref<4x128xf32, #tpu.memory_space<vmem>>, vector<1x128xf32>
    %c3 = arith.constant 3 : index
    %c0_48 = arith.constant 0 : index
    %53 = vector.load %arg6[%c3, %c0_48] : memref<4x128xf32, #tpu.memory_space<vmem>>, vector<1x128xf32>
    %cst_49 = arith.constant dense<0.000000e+00> : vector<128xf32>
    %54 = vector.multi_reduction <add>, %50, %cst_49 [0] : vector<32x128xf32> to vector<128xf32>
    %55 = vector.shape_cast %54 : vector<128xf32> to vector<1x128xf32>
    %cst_50 = arith.constant dense<0.000000e+00> : vector<1x128xf32>
    %56 = tpu.matmul %55, %51, %cst_50 {dimension_numbers = #tpu.dot_dimension_numbers<[1], [0], [0], [1], [0, 0, 1, 1], [], []>} : vector<1x128xf32>, vector<128x128xf32>, vector<1x128xf32> -> vector<1x128xf32>
    %57 = vector.broadcast %56 : vector<1x128xf32> to vector<32x128xf32>
    %58 = arith.subf %50, %57 : vector<32x128xf32>
    %59 = arith.mulf %58, %58 : vector<32x128xf32>
    %cst_51 = arith.constant dense<0.000000e+00> : vector<128xf32>
    %60 = vector.multi_reduction <add>, %59, %cst_51 [0] : vector<32x128xf32> to vector<128xf32>
    %61 = vector.shape_cast %60 : vector<128xf32> to vector<1x128xf32>
    %cst_52 = arith.constant dense<0.000000e+00> : vector<1x128xf32>
    %62 = tpu.matmul %61, %51, %cst_52 {dimension_numbers = #tpu.dot_dimension_numbers<[1], [0], [0], [1], [0, 0, 1, 1], [], []>} : vector<1x128xf32>, vector<128x128xf32>, vector<1x128xf32> -> vector<1x128xf32>
    %cst_53 = arith.constant 9.99999974E-6 : f32
    %63 = vector.broadcast %cst_53 : f32 to vector<1x128xf32>
    %64 = arith.addf %62, %63 : vector<1x128xf32>
    %65 = math.rsqrt %64 : vector<1x128xf32>
    %66 = arith.mulf %52, %65 : vector<1x128xf32>
    %67 = vector.broadcast %66 : vector<1x128xf32> to vector<32x128xf32>
    %68 = arith.mulf %58, %67 : vector<32x128xf32>
    %69 = vector.broadcast %53 : vector<1x128xf32> to vector<32x128xf32>
    %70 = arith.addf %68, %69 : vector<32x128xf32>
    %cst_54 = arith.constant 0.000000e+00 : f32
    %71 = vector.broadcast %cst_54 : f32 to vector<32x128xf32>
    %72 = arith.maximumf %70, %71 : vector<32x128xf32>
    %cst_55 = arith.constant 0.000000e+00 : f32
    %73 = vector.broadcast %cst_55 : f32 to vector<2x18x144xf32>
    %c0_56 = arith.constant 0 : index
    %c0_57 = arith.constant 0 : index
    %c0_58 = arith.constant 0 : index
    %74 = vector.load %arg10[%c0_56, %c0_57, %c0_58] : memref<2x18x144xf32, #tpu.memory_space<vmem>>, vector<2x18x144xf32>
    tpu.vector_store %arg10[%c0_56, %c0_57, %c0_58], %73 {strides = array<i32>} : memref<2x18x144xf32, #tpu.memory_space<vmem>>, vector<2x18x144xf32>,
    %75 = vector.shape_cast %72 : vector<32x128xf32> to vector<2x16x128xf32>
    %c0_59 = arith.constant 0 : index
    %c1_60 = arith.constant 1 : index
    %c8_61 = arith.constant 8 : index
    %76 = vector.load %arg10[%c0_59, %c1_60, %c8_61] : memref<2x18x144xf32, #tpu.memory_space<vmem>>, vector<2x16x128xf32>
    tpu.vector_store %arg10[%c0_59, %c1_60, %c8_61], %75 {strides = array<i32>} : memref<2x18x144xf32, #tpu.memory_space<vmem>>, vector<2x16x128xf32>,
    %c0_62 = arith.constant 0 : index
    %c0_63 = arith.constant 0 : index
    %c0_64 = arith.constant 0 : index
    %77 = vector.load %arg10[%c0_62, %c0_63, %c0_64] : memref<2x18x144xf32, #tpu.memory_space<vmem>>, vector<2x16x144xf32>
    %78 = vector.shape_cast %77 : vector<2x16x144xf32> to vector<32x144xf32>
    %c0_65 = arith.constant 0 : index
    %c0_66 = arith.constant 0 : index
    %c0_67 = arith.constant 0 : index
    %79 = vector.load %arg2[%c0_65, %c0_66, %c0_67] : memref<3x144x128xf32, #tpu.memory_space<vmem>>, vector<1x144x128xf32>
    %80 = vector.shape_cast %79 : vector<1x144x128xf32> to vector<144x128xf32>
    %cst_68 = arith.constant dense<0.000000e+00> : vector<32x128xf32>
    %81 = tpu.matmul %78, %80, %cst_68 {dimension_numbers = #tpu.dot_dimension_numbers<[1], [0], [0], [1], [0, 0, 1, 1], [], []>} : vector<32x144xf32>, vector<144x128xf32>, vector<32x128xf32> -> vector<32x128xf32>
    %c0_69 = arith.constant 0 : index
    %c1_70 = arith.constant 1 : index
    %c0_71 = arith.constant 0 : index
    %82 = vector.load %arg10[%c0_69, %c1_70, %c0_71] : memref<2x18x144xf32, #tpu.memory_space<vmem>>, vector<2x16x144xf32>
    %83 = vector.shape_cast %82 : vector<2x16x144xf32> to vector<32x144xf32>
    %c1_72 = arith.constant 1 : index
    %c0_73 = arith.constant 0 : index
    %c0_74 = arith.constant 0 : index
    %84 = vector.load %arg2[%c1_72, %c0_73, %c0_74] : memref<3x144x128xf32, #tpu.memory_space<vmem>>, vector<1x144x128xf32>
    %85 = vector.shape_cast %84 : vector<1x144x128xf32> to vector<144x128xf32>
    %cst_75 = arith.constant dense<0.000000e+00> : vector<32x128xf32>
    %86 = tpu.matmul %83, %85, %cst_75 {dimension_numbers = #tpu.dot_dimension_numbers<[1], [0], [0], [1], [0, 0, 1, 1], [], []>} : vector<32x144xf32>, vector<144x128xf32>, vector<32x128xf32> -> vector<32x128xf32>
    %87 = arith.addf %81, %86 : vector<32x128xf32>
    %c0_76 = arith.constant 0 : index
    %c2_77 = arith.constant 2 : index
    %c0_78 = arith.constant 0 : index
    %88 = vector.load %arg10[%c0_76, %c2_77, %c0_78] : memref<2x18x144xf32, #tpu.memory_space<vmem>>, vector<2x16x144xf32>
    %89 = vector.shape_cast %88 : vector<2x16x144xf32> to vector<32x144xf32>
    %c2_79 = arith.constant 2 : index
    %c0_80 = arith.constant 0 : index
    %c0_81 = arith.constant 0 : index
    %90 = vector.load %arg2[%c2_79, %c0_80, %c0_81] : memref<3x144x128xf32, #tpu.memory_space<vmem>>, vector<1x144x128xf32>
    %91 = vector.shape_cast %90 : vector<1x144x128xf32> to vector<144x128xf32>
    %cst_82 = arith.constant dense<0.000000e+00> : vector<32x128xf32>
    %92 = tpu.matmul %89, %91, %cst_82 {dimension_numbers = #tpu.dot_dimension_numbers<[1], [0], [0], [1], [0, 0, 1, 1], [], []>} : vector<32x144xf32>, vector<144x128xf32>, vector<32x128xf32> -> vector<32x128xf32>
    %93 = arith.addf %87, %92 : vector<32x128xf32>
    %c0_83 = arith.constant 0 : index
    %c0_84 = arith.constant 0 : index
    %c0_85 = arith.constant 0 : index
    %94 = vector.load %arg8[%c0_83, %c0_84, %c0_85] : memref<2x20x80xf32, #tpu.memory_space<vmem>>, vector<2x16x80xf32>
    %95 = vector.shape_cast %94 : vector<2x16x80xf32> to vector<32x80xf32>
    %c0_86 = arith.constant 0 : index
    %c0_87 = arith.constant 0 : index
    %c0_88 = arith.constant 0 : index
    %96 = vector.load %arg3[%c0_86, %c0_87, %c0_88] : memref<5x80x128xf32, #tpu.memory_space<vmem>>, vector<1x80x128xf32>
    %97 = vector.shape_cast %96 : vector<1x80x128xf32> to vector<80x128xf32>
    %cst_89 = arith.constant dense<0.000000e+00> : vector<32x128xf32>
    %98 = tpu.matmul %95, %97, %cst_89 {dimension_numbers = #tpu.dot_dimension_numbers<[1], [0], [0], [1], [0, 0, 1, 1], [], []>} : vector<32x80xf32>, vector<80x128xf32>, vector<32x128xf32> -> vector<32x128xf32>
    %c0_90 = arith.constant 0 : index
    %c1_91 = arith.constant 1 : index
    %c0_92 = arith.constant 0 : index
    %99 = vector.load %arg8[%c0_90, %c1_91, %c0_92] : memref<2x20x80xf32, #tpu.memory_space<vmem>>, vector<2x16x80xf32>
    %100 = vector.shape_cast %99 : vector<2x16x80xf32> to vector<32x80xf32>
    %c1_93 = arith.constant 1 : index
    %c0_94 = arith.constant 0 : index
    %c0_95 = arith.constant 0 : index
    %101 = vector.load %arg3[%c1_93, %c0_94, %c0_95] : memref<5x80x128xf32, #tpu.memory_space<vmem>>, vector<1x80x128xf32>
    %102 = vector.shape_cast %101 : vector<1x80x128xf32> to vector<80x128xf32>
    %cst_96 = arith.constant dense<0.000000e+00> : vector<32x128xf32>
    %103 = tpu.matmul %100, %102, %cst_96 {dimension_numbers = #tpu.dot_dimension_numbers<[1], [0], [0], [1], [0, 0, 1, 1], [], []>} : vector<32x80xf32>, vector<80x128xf32>, vector<32x128xf32> -> vector<32x128xf32>
    %104 = arith.addf %98, %103 : vector<32x128xf32>
    %c0_97 = arith.constant 0 : index
    %c2_98 = arith.constant 2 : index
    %c0_99 = arith.constant 0 : index
    %105 = vector.load %arg8[%c0_97, %c2_98, %c0_99] : memref<2x20x80xf32, #tpu.memory_space<vmem>>, vector<2x16x80xf32>
    %106 = vector.shape_cast %105 : vector<2x16x80xf32> to vector<32x80xf32>
    %c2_100 = arith.constant 2 : index
    %c0_101 = arith.constant 0 : index
    %c0_102 = arith.constant 0 : index
    %107 = vector.load %arg3[%c2_100, %c0_101, %c0_102] : memref<5x80x128xf32, #tpu.memory_space<vmem>>, vector<1x80x128xf32>
    %108 = vector.shape_cast %107 : vector<1x80x128xf32> to vector<80x128xf32>
    %cst_103 = arith.constant dense<0.000000e+00> : vector<32x128xf32>
    %109 = tpu.matmul %106, %108, %cst_103 {dimension_numbers = #tpu.dot_dimension_numbers<[1], [0], [0], [1], [0, 0, 1, 1], [], []>} : vector<32x80xf32>, vector<80x128xf32>, vector<32x128xf32> -> vector<32x128xf32>
    %110 = arith.addf %104, %109 : vector<32x128xf32>
    %c0_104 = arith.constant 0 : index
    %c3_105 = arith.constant 3 : index
    %c0_106 = arith.constant 0 : index
    %111 = vector.load %arg8[%c0_104, %c3_105, %c0_106] : memref<2x20x80xf32, #tpu.memory_space<vmem>>, vector<2x16x80xf32>
    %112 = vector.shape_cast %111 : vector<2x16x80xf32> to vector<32x80xf32>
    %c3_107 = arith.constant 3 : index
    %c0_108 = arith.constant 0 : index
    %c0_109 = arith.constant 0 : index
    %113 = vector.load %arg3[%c3_107, %c0_108, %c0_109] : memref<5x80x128xf32, #tpu.memory_space<vmem>>, vector<1x80x128xf32>
    %114 = vector.shape_cast %113 : vector<1x80x128xf32> to vector<80x128xf32>
    %cst_110 = arith.constant dense<0.000000e+00> : vector<32x128xf32>
    %115 = tpu.matmul %112, %114, %cst_110 {dimension_numbers = #tpu.dot_dimension_numbers<[1], [0], [0], [1], [0, 0, 1, 1], [], []>} : vector<32x80xf32>, vector<80x128xf32>, vector<32x128xf32> -> vector<32x128xf32>
    %116 = arith.addf %110, %115 : vector<32x128xf32>
    %c0_111 = arith.constant 0 : index
    %c4_112 = arith.constant 4 : index
    %c0_113 = arith.constant 0 : index
    %117 = vector.load %arg8[%c0_111, %c4_112, %c0_113] : memref<2x20x80xf32, #tpu.memory_space<vmem>>, vector<2x16x80xf32>
    %118 = vector.shape_cast %117 : vector<2x16x80xf32> to vector<32x80xf32>
    %c4_114 = arith.constant 4 : index
    %c0_115 = arith.constant 0 : index
    %c0_116 = arith.constant 0 : index
    %119 = vector.load %arg3[%c4_114, %c0_115, %c0_116] : memref<5x80x128xf32, #tpu.memory_space<vmem>>, vector<1x80x128xf32>
    %120 = vector.shape_cast %119 : vector<1x80x128xf32> to vector<80x128xf32>
    %cst_117 = arith.constant dense<0.000000e+00> : vector<32x128xf32>
    %121 = tpu.matmul %118, %120, %cst_117 {dimension_numbers = #tpu.dot_dimension_numbers<[1], [0], [0], [1], [0, 0, 1, 1], [], []>} : vector<32x80xf32>, vector<80x128xf32>, vector<32x128xf32> -> vector<32x128xf32>
    %122 = arith.addf %116, %121 : vector<32x128xf32>
    %123 = arith.addf %93, %122 : vector<32x128xf32>
    %c0_118 = arith.constant 0 : index
    %c0_119 = arith.constant 0 : index
    %124 = vector.load %arg7[%c0_118, %c0_119] : memref<32x128xf32, #tpu.memory_space<vmem>>, vector<32x128xf32>
    tpu.vector_store %arg7[%c0_118, %c0_119], %123 {strides = array<i32>} : memref<32x128xf32, #tpu.memory_space<vmem>>, vector<32x128xf32>,
    return
  }
}

</mosaic_0001>

<bundles_post_ra>
// kernel: tpu_custom_call.1
= control target key start
LH: loop header
LB: loop body
LE: loop exit
PB: predicated region body
PF: predicated region fallthrough
CT: control target
= control target key end

     0   :  { %12 = vsyncpa [#allocation6], 0  ;;  %s3548_s0 = inlined_call_operand.hbm [shape: f32[2,16,64], index: 0, kind: input, shape index: {}]   ;;  %s3549_s1 = inlined_call_operand.hbm [shape: f32[3,72,128], index: 1, kind: input, shape index: {}]   ;;  %s3550_s2 = inlined_call_operand.hbm [shape: f32[3,144,128], index: 2, kind: input, shape index: {}]   ;;  %s3551_s3 = inlined_call_operand.hbm [shape: f32[5,80,128], index: 3, kind: input, shape index: {}]   ;;  %s3552_s4 = inlined_call_operand.hbm [shape: f32[64,64], index: 4, kind: input, shape index: {}]   ;;  %s3553_s5 = inlined_call_operand.hbm [shape: f32[128,128], index: 5, kind: input, shape index: {}]   ;;  %s3554_s6 = inlined_call_operand.vmem [shape: f32[4,128], index: 6, kind: input, shape index: {}]   ;;  %s3555_s7 = inlined_call_operand.hbm [shape: f32[32,128], index: 7, kind: output, shape index: {}]  }
   0x1   :  { %13 = vsyncpa [#allocation9], 0 }
   0x2   :  { %14 = vsyncpa [#allocation12], 0 }
   0x3   :  { %15 = vsyncpa [#allocation15], 0 }
   0x4   :  { %16 = vsyncpa [#allocation7], 0  ;;  %s3070_s24 = smov [#allocation8]   ;;  %s3071_s26 = smov [#allocation11]  }
   0x5   :  { %s34_s25 = sshll.u32 %s3070_s24, 4  ;;  %s58_s27 = sshll.u32 %s3071_s26, 4  ;;  %s35_s25 = int_to_ptr.vmem [resolvable:$true] %s34_s25  ;;  %s3123_s27 = int_to_ptr.vmem [resolvable:$true] %s58_s27 }
   0x6   :  { %s2906_s30 = scalar_lea.hbm %s3549_s1, 3456 }
   0x7   :  { %p2907_p0 = scmp.ne.s32.totalorder %s3549_s1, %s2906_s30  ;;  %p2910_p1 = scmp.lt.u32.totalorder %s2906_s30, %s3549_s1 }
   0x9   :  { %p2912_p2 = pnand %p2910_p1, %p2907_p0 }
   0xb   :  { %2915 = shalt.err (!%p2912_p2)
}
   0xc   :  { %s2916_s12 = scalar_lea.vmem %s35_s25, 3456  ;;  %p2921_p4 = scmp.lt.s32.totalorder %s35_s25, %s35_s25 }
   0xd   :  { %p2917_p3 = scmp.ne.s32.totalorder %s35_s25, %s2916_s12  ;;  %p2922_p5 = scmp.lt.s32.totalorder %s2916_s12, %s2916_s12 }
   0xf   :  { %p2923_p6 = por %p2922_p5, %p2921_p4 }
  0x11   :  { %p2924_p7 = pnand %p2923_p6, %p2917_p3 }
  0x13   :  { %2927 = shalt.err (!%p2924_p7)
}
  0x14   :  { %s3072_s13 = smov 128   ;;  %s3073_s14 = smov 8  }
  0x15   :  { %40 = dma.hbm_to_vmem [thread:$0]  %s3549_s1, 3456, %s35_s25, [#allocation9], %s3072_s13, %s3072_s13, %s3073_s14  }
  0x16   :  { %s2928_s19 = scalar_lea.hbm %s3551_s3, 6400 }
  0x17   :  { %p2929_p8 = scmp.ne.s32.totalorder %s3551_s3, %s2928_s19  ;;  %p2932_p9 = scmp.lt.u32.totalorder %s2928_s19, %s3551_s3 }
  0x19   :  { %p2934_p10 = pnand %p2932_p9, %p2929_p8 }
  0x1b   :  { %2937 = shalt.err (!%p2934_p10)
}
  0x1c   :  { %s2938_s24 = scalar_lea.vmem %s3123_s27, 6400  ;;  %p2943_p12 = scmp.lt.s32.totalorder %s3123_s27, %s3123_s27 }
  0x1d   :  { %p2939_p11 = scmp.ne.s32.totalorder %s3123_s27, %s2938_s24  ;;  %p2944_p13 = scmp.lt.s32.totalorder %s2938_s24, %s2938_s24 }
  0x1f   :  { %p2945_p0 = por %p2944_p13, %p2943_p12 }
  0x21   :  { %p2946_p1 = pnand %p2945_p0, %p2939_p11 }
  0x23   :  { %2949 = shalt.err (!%p2946_p1)
}
  0x24   :  { %64 = dma.hbm_to_vmem [thread:$0]  %s3551_s3, 6400, %s3123_s27, [#allocation12], %s3072_s13, %s3072_s13, %s3073_s14  }
  0x25   :  { %s3074_s26 = smov [#allocation5]   ;;  %s3075_s29 = smov [#allocation10]  }
  0x26   :  { %s22_s28 = sshll.u32 %s3074_s26, 4  ;;  %s46_s30 = sshll.u32 %s3075_s29, 4  ;;  %s23_s28 = int_to_ptr.vmem [resolvable:$true] %s22_s28  ;;  %s3160_s30 = int_to_ptr.vmem [resolvable:$true] %s46_s30 }
  0x27   :  { %s2950_s10 = scalar_lea.hbm %s3548_s0, 512 }
  0x28   :  { %p2951_p2 = scmp.ne.s32.totalorder %s3548_s0, %s2950_s10  ;;  %p2954_p3 = scmp.lt.u32.totalorder %s2950_s10, %s3548_s0 }
  0x2a   :  { %p2956_p4 = pnand %p2954_p3, %p2951_p2 }
  0x2c   :  { %2959 = shalt.err (!%p2956_p4)
}
  0x2d   :  { %s2960_s3 = scalar_lea.vmem %s23_s28, 512  ;;  %p2965_p6 = scmp.lt.s32.totalorder %s23_s28, %s23_s28 }
  0x2e   :  { %p2961_p5 = scmp.ne.s32.totalorder %s23_s28, %s2960_s3  ;;  %p2966_p7 = scmp.lt.s32.totalorder %s2960_s3, %s2960_s3 }
  0x30   :  { %p2967_p8 = por %p2966_p7, %p2965_p6 }
  0x32   :  { %p2968_p9 = pnand %p2967_p8, %p2961_p5 }
  0x34   :  { %2971 = shalt.err (!%p2968_p9)
}
  0x35   :  { %28 = dma.hbm_to_vmem [thread:$0]  %s3548_s0, 512, %s23_s28, [#allocation6], %s3072_s13, %s3072_s13, %s3073_s14  }
  0x36   :  { %s2972_s20 = scalar_lea.hbm %s3550_s2, 6912 }
  0x37   :  { %p2973_p10 = scmp.ne.s32.totalorder %s3550_s2, %s2972_s20  ;;  %p2976_p11 = scmp.lt.u32.totalorder %s2972_s20, %s3550_s2 }
  0x39   :  { %p2978_p12 = pnand %p2976_p11, %p2973_p10 }
  0x3b   :  { %2981 = shalt.err (!%p2978_p12)
}
  0x3c   :  { %s2982_s1 = scalar_lea.vmem %s3160_s30, 6912  ;;  %p2987_p0 = scmp.lt.s32.totalorder %s3160_s30, %s3160_s30 }
  0x3d   :  { %p2983_p13 = scmp.ne.s32.totalorder %s3160_s30, %s2982_s1  ;;  %p2988_p1 = scmp.lt.s32.totalorder %s2982_s1, %s2982_s1 }
  0x3f   :  { %p2989_p2 = por %p2988_p1, %p2987_p0 }
  0x41   :  { %p2990_p3 = pnand %p2989_p2, %p2983_p13 }
  0x43   :  { %2993 = shalt.err (!%p2990_p3)
}
  0x44   :  { %52 = dma.hbm_to_vmem [thread:$0]  %s3550_s2, 6912, %s3160_s30, [#allocation9], %s3072_s13, %s3072_s13, %s3073_s14  }
  0x45   :  { %s3076_s26 = smov [#allocation13]   ;;  %s3077_s29 = smov [#allocation14]  }
  0x46   :  { %s70_s28 = sshll.u32 %s3076_s26, 4  ;;  %s82_s8 = sshll.u32 %s3077_s29, 4  ;;  %s71_s28 = int_to_ptr.vmem [resolvable:$true] %s70_s28  ;;  %s3197_s8 = int_to_ptr.vmem [resolvable:$true] %s82_s8 }
  0x47   :  { %s2994_s11 = scalar_lea.hbm %s3552_s4, 1024 }
  0x48   :  { %p2995_p4 = scmp.ne.s32.totalorder %s3552_s4, %s2994_s11  ;;  %p2998_p5 = scmp.lt.u32.totalorder %s2994_s11, %s3552_s4 }
  0x4a   :  { %p3000_p6 = pnand %p2998_p5, %p2995_p4 }
  0x4c   :  { %3003 = shalt.err (!%p3000_p6)
}
  0x4d   :  { %s3004_s2 = scalar_lea.vmem %s71_s28, 1024  ;;  %p3009_p8 = scmp.lt.s32.totalorder %s71_s28, %s71_s28 }
  0x4e   :  { %p3005_p7 = scmp.ne.s32.totalorder %s71_s28, %s3004_s2  ;;  %p3010_p9 = scmp.lt.s32.totalorder %s3004_s2, %s3004_s2 }
  0x50   :  { %p3011_p10 = por %p3010_p9, %p3009_p8 }
  0x52   :  { %p3012_p11 = pnand %p3011_p10, %p3005_p7 }
  0x54   :  { %3015 = shalt.err (!%p3012_p11)
}
  0x55   :  { %76 = dma.hbm_to_vmem [thread:$0]  %s3552_s4, 1024, %s71_s28, [#allocation12], %s3072_s13, %s3072_s13, %s3073_s14  }
  0x56   :  { %s3016_s19 = scalar_lea.hbm %s3553_s5, 2048 }
  0x57   :  { %p3017_p12 = scmp.ne.s32.totalorder %s3553_s5, %s3016_s19  ;;  %p3020_p13 = scmp.lt.u32.totalorder %s3016_s19, %s3553_s5 }
  0x59   :  { %p3022_p0 = pnand %p3020_p13, %p3017_p12 }
  0x5b   :  { %3025 = shalt.err (!%p3022_p0)
}
  0x5c   :  { %s3026_s24 = scalar_lea.vmem %s3197_s8, 2048  ;;  %p3031_p2 = scmp.lt.s32.totalorder %s3197_s8, %s3197_s8 }
  0x5d   :  { %p3027_p1 = scmp.ne.s32.totalorder %s3197_s8, %s3026_s24  ;;  %p3032_p3 = scmp.lt.s32.totalorder %s3026_s24, %s3026_s24 }
  0x5f   :  { %p3033_p4 = por %p3032_p3, %p3031_p2 }
  0x61   :  { %p3034_p5 = pnand %p3033_p4, %p3027_p1 }
  0x63   :  { %3037 = shalt.err (!%p3034_p5)
}
  0x64   :  { %88 = dma.hbm_to_vmem [thread:$0]  %s3553_s5, 2048, %s3197_s8, [#allocation15], %s3072_s13, %s3072_s13, %s3073_s14  }
  0x65   :  { %3060 = dma.done.wait [#allocation6], 512  }
  0x66   :  { %3061 = vsyncadd [#allocation6], 4294966784 }
  0x67   :  { %3062 = dma.done.wait [#allocation9], 10368  }
  0x68   :  { %3063 = vsyncadd [#allocation9], 4294956928 }
  0x69   :  { %3064 = dma.done.wait [#allocation12], 7424  }
  0x6a   :  { %3065 = vsyncadd [#allocation12], 4294959872 }
  0x6b   :  { %3066 = dma.done.wait [#allocation15], 2048  }
  0x6c   :  { %3067 = vsyncadd [#allocation15], 4294965248  ;;  %v3078_v0 = vmov 0.0|0.0   ;;  %vm3079_vm0 = vmmov 0   ;;  %v3080_v1 = vmov 0.0   ;;  %v142_v2 = vld [vmem:[#allocation13] sm:$0xff]  ;;  %v239_v31 = vlaneseq }
  0x6d   :  { %2548 = vmatprep.subr.bf16.mxu0 %v3078_v0  ;;  %2254 = vmatprep.mubr.msk.f32.mxu0 %vm3079_vm0, %v3080_v1  ;;  %934 = vst [vmem:[#allocation4] sm:$0xff] %v3080_v1  ;;  %937 = vst [vmem:[#allocation4 + $0x10] sm:$0xff] %v3080_v1  ;;  %v143_v3 = vld [vmem:[#allocation13 + $0x8] sm:$0xff]  ;;  %v144_v4 = vld [vmem:[#allocation13 + $0x10] sm:$0xff]  ;;  %vm152_vm1 = vcmask 523264   ;;  %vm359_vm2 = vcmask 588800  }
  0x6e   :  { %939 = vst [vmem:[#allocation4 + $0x20] sm:$0x3] %v3080_v1  ;;  %942 = vst [vmem:[#allocation4 + $0x30] sm:$0xff] %v3080_v1  ;;  %2560 = vmatprep.subr.bf16.mxu1 %v3078_v0  ;;  %2273 = vmatprep.mubr.msk.f32.mxu1 %vm3079_vm0, %v3080_v1  ;;  %v2549_v5 = vpack.c.bf16 %v143_v3, %v142_v2  ;;  %v145_v6 = vld [vmem:[#allocation13 + $0x18] sm:$0xff]  ;;  %v3246_v7 = vld [vmem:[#allocation5] sm:$0xff]  ;;  %v240_v32 = vshrl.u32 %v239_v31, 7 }
  0x6f   :  { %944 = vst [vmem:[#allocation4 + $0x40] sm:$0xff] %v3080_v1  ;;  %946 = vst [vmem:[#allocation4 + $0x50] sm:$0x3] %v3080_v1  ;;  %v2552_v8 = vpack.c.bf16 %v145_v6, %v144_v4  ;;  %v3248_v9 = vld [vmem:[#allocation5 + $0x8] sm:$0xff]  ;;  %v3250_v10 = vld [vmem:[#allocation5 + $0x10] sm:$0xff]  ;;  %v153_v12 = vsel %vm152_vm1, %v3246_v7, 0.0 }
  0x70   :  { %2550 = vmatpush3.bf16.msra.mxu0 %v2549_v5  ;;  %v3252_v11 = vld [vmem:[#allocation5 + $0x18] sm:$0xff]  ;;  %2562 = vmatpush3.bf16.msra.mxu1 %v2549_v5  ;;  %v147_v14 = vld [vmem:[#allocation13 + $0x28] sm:$0xff]  ;;  %v154_v15 = vsel %vm152_vm1, %v3248_v9, 0.0  ;;  %v156_v16 = vsel %vm152_vm1, %v3250_v10, 0.0  ;;  %v148_v21 = vld [vmem:[#allocation13 + $0x30] sm:$0xff]  ;;  %v3270_v33 = vsub.s32 0, %v240_v32 }
  0x71   :  { %2551 = vmatprep.subr.bf16.mxu0 %v3078_v0  ;;  %v146_v13 = vld [vmem:[#allocation13 + $0x20] sm:$0xff]  ;;  %2563 = vmatprep.subr.bf16.mxu1 %v3078_v0  ;;  %v155_v17 = vadd.f32 %v154_v15, %v153_v12  ;;  %v158_v18 = vsel %vm152_vm1, %v3252_v11, 0.0  ;;  %v149_v22 = vld [vmem:[#allocation13 + $0x38] sm:$0xff]  ;;  %v406_v58 = vld [vmem:[#allocation8 + $0x48] sm:$0xff]  ;;  %364 = vst.msk [vmem:[#allocation3 + $0x18] sm:$0xff] %vm359_vm2, %v3080_v1  ;;  %vm362_vm3 = vcmask 582656  }
  0x72   :  { %v2555_v19 = vpack.c.bf16 %v147_v14, %v146_v13  ;;  %v2558_v24 = vpack.c.bf16 %v149_v22, %v148_v21  ;;  %v407_v59 = vld [vmem:[#allocation8 + $0x50] sm:$0xff]  ;;  %v408_v60 = vld [vmem:[#allocation8 + $0x58] sm:$0xff]  ;;  %v409_v62 = vld [vmem:[#allocation8 + $0x60] sm:$0xff]  ;;  %365 = vst.msk [vmem:[#allocation3 + $0x20] sm:$0xff] %vm359_vm2, %v3080_v1  ;;  %s3081_s28 = smov 4   ;;  %vm383_vm4 = vcmask 556064  }
  0x73   :  { %v157_v20 = vadd.f32 %v156_v16, %v155_v17  ;;  %v2572_v61 = vpack.c.bf16 %v407_v59, %v406_v58  ;;  %360 = vst.msk [vmem:[#allocation3] sm:$0xff] %vm359_vm2, %v3080_v1  ;;  %361 = vst.msk [vmem:[#allocation3 + $0x8] sm:$0xff] %vm359_vm2, %v3080_v1  ;;  %v2576_v63 = vpack.c.bf16 %v409_v62, %v408_v60  ;;  %v410_v5 = vld [vmem:[#allocation8 + $0x68] sm:$0xff]  ;;  %v411_v6 = vld [vmem:[#allocation8 + $0x70] sm:$0xff]  ;;  %vm935_vm5 = vcmask 130048  }
  0x74   :  { %2553 = vmatpush3.bf16.msra.mxu0 %v2552_v8  ;;  %2565 = vmatpush3.bf16.msra.mxu1 %v2552_v8  ;;  %v2580_v8 = vpack.c.bf16 %v411_v6, %v410_v5  ;;  %v150_v12 = vld [vmem:[%s3554_s6] sm:$0x1]  ;;  %366 = vst.msk [vmem:[#allocation3 + $0x28] sm:$0x3] %vm362_vm3, %v3080_v1  ;;  %363 = vst.msk [vmem:[#allocation3 + $0x10] sm:$0x3] %vm362_vm3, %v3080_v1 }
  0x75   :  { %2554 = vmatprep.subr.bf16.mxu0 %v3078_v0  ;;  %2566 = vmatprep.subr.bf16.mxu1 %v3078_v0  ;;  %v159_v23 = vadd.f32 %v158_v18, %v157_v20  ;;  %v412_v14 = vld [vmem:[#allocation8 + $0x78] sm:$0xff]  ;;  %v413_v15 = vld [vmem:[#allocation8 + $0x80] sm:$0xff]  ;;  %v398_v60 = vld [vmem:[#allocation8 + $0x30] sm:$0xff]  ;;  %936 = vst.msk [vmem:[#allocation4 + $0x8] sm:$0xff] %vm935_vm5, %v3080_v1  ;;  %vm113_vm6 = vcmask 654336   ;;  %vm116_vm7 = vcmask 650240  }
  0x76   :  { %v2584_v17 = vpack.c.bf16 %v413_v15, %v412_v14  ;;  %v616_v5 = vld [vmem:[#allocation8 + $0xa0] sm:$0xff]  ;;  %v617_v6 = vld [vmem:[#allocation8 + $0xa8] sm:$0xff]  ;;  %v618_v14 = vld [vmem:[#allocation8 + $0xb0] sm:$0xff]  ;;  %938 = vst.msk [vmem:[#allocation4 + $0x18] sm:$0xff] %vm935_vm5, %v3080_v1  ;;  %vm952_vm8 = vcmask 1040384   ;;  %vm940_vm9 = vcmask 123904  }
  0x77   :  { %v160_v25 = vrot.slane %v159_v23, 4  ;;  %v619_v15 = vld [vmem:[#allocation8 + $0xb8] sm:$0xff]  ;;  %943 = vst.msk [vmem:[#allocation4 + $0x38] sm:$0xff] %vm935_vm5, %v3080_v1  ;;  %945 = vst.msk [vmem:[#allocation4 + $0x48] sm:$0xff] %vm935_vm5, %v3080_v1  ;;  %vm977_vm10 = vcmask 1047617   ;;  %vm979_vm11 = vcmask 64513  }
  0x78   :  { %2556 = vmatpush3.bf16.msra.mxu0 %v2555_v19  ;;  %2568 = vmatpush3.bf16.msra.mxu1 %v2555_v19  ;;  %v2031_v19 = vld [vmem:[%s3554_s6 + $0x1] ss:$0 sm:$0xff]  ;;  %114 = vst.msk [vmem:[#allocation2] sm:$0xff] %vm113_vm6, %v3080_v1  ;;  %115 = vst.msk [vmem:[#allocation2 + $0x8] sm:$0xff] %vm113_vm6, %v3080_v1  ;;  %vm981_vm12 = vcmask 1047616   ;;  %vm983_vm13 = vcmask 64512  }
  0x79   :  { %2557 = vmatprep.subr.bf16.mxu0 %v3078_v0  ;;  %2569 = vmatprep.subr.bf16.mxu1 %v3078_v0  ;;  %v161_v26 = vadd.f32 %v160_v25, %v159_v23  ;;  %v392_v25 = vld [vmem:[#allocation8] sm:$0xff]  ;;  %118 = vst.msk [vmem:[#allocation2 + $0x18] sm:$0xff] %vm113_vm6, %v3080_v1  ;;  %119 = vst.msk [vmem:[#allocation2 + $0x20] sm:$0xff] %vm113_vm6, %v3080_v1  ;;  %vm137_vm14 = vcmask 588864   ;;  %vm1041_vm15 = vcmask 1046528  }
  0x7a   :  { %117 = vst.msk [vmem:[#allocation2 + $0x10] sm:$0xf] %vm116_vm7, %v3080_v1  ;;  %120 = vst.msk [vmem:[#allocation2 + $0x28] sm:$0xf] %vm116_vm7, %v3080_v1 }
  0x7b   :  { %v162_v27 = vrot.slane %v161_v26, 2  ;;  %941 = vst.msk [vmem:[#allocation4 + $0x28] sm:$0x3] %vm940_vm9, %v3080_v1  ;;  %947 = vst.msk [vmem:[#allocation4 + $0x58] sm:$0x3] %vm940_vm9, %v3080_v1 }
  0x7c   :  { %2559 = vmatpush3.bf16.msra.mxu0 %v2558_v24  ;;  %2571 = vmatpush3.bf16.msra.mxu1 %v2558_v24  ;;  %v414_v24 = vld [vmem:[#allocation8 + $0x88] sm:$0xff] }
  0x7d   :  { %2620 = vmatprep.subr.bf16.mxu1 %v3078_v0  ;;  %v163_v28 = vadd.f32 %v162_v27, %v161_v26  ;;  %2573 = vmatprep.subr.bf16.mxu0 %v2572_v61  ;;  %v393_v26 = vld [vmem:[#allocation8 + $0x8] sm:$0xff] }
  0x7f   :  { %v164_v29 = vrot.slane %v163_v28, 1 }
  0x81   :  { %v165_v30 = vadd.f32 %v164_v29, %v163_v28  ;;  %v2588_v29 = vpack.c.bf16 %v393_v26, %v392_v25 }
  0x83   :  { %2255 = vmatmul.mubr.msk.f32.vlgmr.msra.gmra.mrb[0].mxu0 %vm152_vm1, %v165_v30 }
  0x84   :  { %2575 = vmatpush3.bf16.msra.mxu0 %v2572_v61  ;;  %v399_v61 = vld [vmem:[#allocation8 + $0x38] sm:$0xff] }
  0x85   :  { %2577 = vmatprep.subr.bf16.mxu0 %v2576_v63 }
  0x88   :  { %2579 = vmatpush3.bf16.msra.mxu0 %v2576_v63  ;;  %v2600_v63 = vpack.c.bf16 %v399_v61, %v398_v60 }
  0x89   :  { %2581 = vmatprep.subr.bf16.mxu0 %v2580_v8 }
  0x8c   :  { %2583 = vmatpush3.bf16.msra.mxu0 %v2580_v8 }
  0x8d   :  { %2585 = vmatprep.subr.bf16.mxu0 %v2584_v17 }
  0x90   :  { %2587 = vmatpush3.bf16.msra.mxu0 %v2584_v17  ;;  %v2612_v17 = vpack.c.bf16 %v619_v15, %v618_v14 }
  0x91   :  { %2292 = vmatprep.subr.mxu0 %v414_v24 }
  0x94   :  { %2293 = vmatpush3.msra.mxu0 %v414_v24 }
  0x95   :  { %2589 = vmatprep.subr.bf16.mxu0 %v2588_v29 }
 0x156   :  { %v235_v34 = vpop.f32.mrb[0].mxu0 }
 0x157   :  { %v242_v35 = vrot.slane %v235_v34, %v3270_v33  ;;  %v2256_v36 = vpop.f32.mrb[1].mxu0 }
 0x159   :  { %v243_v37 = vsub.f32 %v3246_v7, %v242_v35  ;;  %v244_v38 = vsub.f32 %v3248_v9, %v242_v35  ;;  %v245_v39 = vsub.f32 %v3250_v10, %v242_v35  ;;  %v246_v40 = vsub.f32 %v3252_v11, %v242_v35 }
 0x15b   :  { %v247_v41 = vmul.f32 %v243_v37, %v243_v37  ;;  %v248_v42 = vmul.f32 %v244_v38, %v244_v38  ;;  %v249_v43 = vmul.f32 %v245_v39, %v245_v39  ;;  %v250_v44 = vmul.f32 %v246_v40, %v246_v40 }
 0x15d   :  { %v251_v45 = vsel %vm152_vm1, %v247_v41, 0.0  ;;  %v252_v46 = vsel %vm152_vm1, %v248_v42, 0.0  ;;  %v254_v48 = vsel %vm152_vm1, %v249_v43, 0.0  ;;  %v256_v50 = vsel %vm152_vm1, %v250_v44, 0.0  ;;  %v727_v41 = vld [vmem:[#allocation14 + $0x18] sm:$0xff]  ;;  %v728_v43 = vld [vmem:[#allocation14 + $0x20] sm:$0xff] }
 0x15e   :  { %v253_v47 = vadd.f32 %v252_v46, %v251_v45  ;;  %v729_v44 = vld [vmem:[#allocation14 + $0x28] sm:$0xff] }
 0x15f   :  { %v3308_v45 = vpack.c.bf16 %v729_v44, %v728_v43  ;;  %v739_v43 = vld [vmem:[#allocation14 + $0x78] sm:$0xff] }
 0x160   :  { %v255_v49 = vadd.f32 %v254_v48, %v253_v47 }
 0x162   :  { %v257_v51 = vadd.f32 %v256_v50, %v255_v49 }
 0x164   :  { %v258_v52 = vrot.slane %v257_v51, 4 }
 0x166   :  { %v259_v53 = vadd.f32 %v258_v52, %v257_v51  ;;  %v394_v51 = vld [vmem:[#allocation8 + $0x10] sm:$0xff]  ;;  %v395_v52 = vld [vmem:[#allocation8 + $0x18] sm:$0xff] }
 0x168   :  { %v260_v54 = vrot.slane %v259_v53, 2 }
 0x16a   :  { %v261_v55 = vadd.f32 %v260_v54, %v259_v53  ;;  %v2592_v53 = vpack.c.bf16 %v395_v52, %v394_v51 }
 0x16c   :  { %v262_v56 = vrot.slane %v261_v55, 1 }
 0x16e   :  { %v263_v57 = vadd.f32 %v262_v56, %v261_v55  ;;  %v396_v55 = vld [vmem:[#allocation8 + $0x20] sm:$0xff]  ;;  %v397_v56 = vld [vmem:[#allocation8 + $0x28] sm:$0xff] }
 0x16f   :  { %v2596_v58 = vpack.c.bf16 %v397_v56, %v396_v55 }
 0x170   :  { %2274 = vmatmul.mubr.msk.f32.vlgmr.msra.gmra.mrb[0].mxu1 %vm152_vm1, %v263_v57  ;;  %vm987_vm1 = vcmask 57344  }
 0x171   :  { %2380 = vmatprep.mubr.msk.f32.mxu1 %vm3079_vm0, %v3080_v1 }
 0x243   :  { %v333_v2 = vpop.f32.mrb[0].mxu1 }
 0x244   :  { %v334_v3 = vadd.f32 1e-05, %v333_v2  ;;  %v2275_v4 = vpop.f32.mrb[1].mxu1  ;;  %v400_v2 = vld [vmem:[#allocation8 + $0x40] sm:$0xff] }
 0x245   :  { %v615_v4 = vld [vmem:[#allocation8 + $0x98] sm:$0xff] }
 0x246   :  { %2902 = vrsqrt.f32 %v334_v3  ;;  %v614_v3 = vld [vmem:[#allocation8 + $0x90] sm:$0xff] }
 0x247   :  { %v2604_v8 = vpack.c.bf16 %v615_v4, %v614_v3 }
 0x250   :  { %v2903_v13 = vpop.eup %2902 }
 0x251   :  { %v338_v16 = vmul.f32 %v2903_v13, %v150_v12  ;;  %v2608_v12 = vpack.c.bf16 %v617_v6, %v616_v5 }
 0x253   :  { %v342_v18 = vrot.slane %v338_v16, %v3270_v33 }
 0x255   :  { %v345_v20 = vmul.f32 %v342_v18, %v245_v39  ;;  %v343_v21 = vmul.f32 %v342_v18, %v243_v37  ;;  %v346_v22 = vmul.f32 %v342_v18, %v246_v40  ;;  %v344_v23 = vmul.f32 %v342_v18, %v244_v38  ;;  %v724_v37 = vld [vmem:[#allocation14] sm:$0xff]  ;;  %v725_v38 = vld [vmem:[#allocation14 + $0x8] sm:$0xff]  ;;  %v726_v39 = vld [vmem:[#allocation14 + $0x10] sm:$0xff] }
 0x256   :  { %v3301_v40 = vpack.c.bf16 %v725_v38, %v724_v37  ;;  %v3304_v42 = vpack.c.bf16 %v727_v41, %v726_v39  ;;  %v736_v37 = vld [vmem:[#allocation14 + $0x60] sm:$0xff]  ;;  %v737_v38 = vld [vmem:[#allocation14 + $0x68] sm:$0xff]  ;;  %v738_v41 = vld [vmem:[#allocation14 + $0x70] sm:$0xff] }
 0x257   :  { %v353_v27 = vadd.f32 %v2031_v19, %v345_v20  ;;  %v351_v28 = vadd.f32 %v2031_v19, %v343_v21  ;;  %v354_v32 = vadd.f32 %v2031_v19, %v346_v22  ;;  %v352_v34 = vadd.f32 %v2031_v19, %v344_v23  ;;  %v620_v19 = vld [vmem:[#allocation8 + $0xc0] sm:$0xff]  ;;  %v621_v20 = vld [vmem:[#allocation8 + $0xc8] sm:$0xff]  ;;  %v622_v23 = vld [vmem:[#allocation8 + $0xd0] sm:$0xff] }
 0x258   :  { %2622 = vmatpush3.bf16.msra.mxu1 %v3301_v40  ;;  %v2616_v22 = vpack.c.bf16 %v621_v20, %v620_v19  ;;  %v2639_v39 = vpack.c.bf16 %v737_v38, %v736_v37  ;;  %v2642_v44 = vpack.c.bf16 %v739_v43, %v738_v41  ;;  %v1068_v19 = vld [vmem:[#allocation10 + $0x98] sm:$0xff]  ;;  %v1069_v20 = vld [vmem:[#allocation10 + $0xa0] sm:$0xff]  ;;  %v1075_v37 = vld [vmem:[#allocation10 + $0xd0] sm:$0xff] }
 0x259   :  { %v357_v30 = vmax.f32 %v353_v27, 0.0  ;;  %v355_v31 = vmax.f32 %v351_v28, 0.0  ;;  %v358_v35 = vmax.f32 %v354_v32, 0.0  ;;  %v356_v36 = vmax.f32 %v352_v34, 0.0  ;;  %2623 = vmatprep.subr.bf16.mxu1 %v3078_v0  ;;  %v730_v27 = vld [vmem:[#allocation14 + $0x30] sm:$0xff]  ;;  %v731_v28 = vld [vmem:[#allocation14 + $0x38] sm:$0xff] }
 0x25a   :  { %v734_v34 = vld [vmem:[#allocation14 + $0x50] sm:$0xff]  ;;  %v1076_v38 = vld [vmem:[#allocation10 + $0xd8] sm:$0xff]  ;;  %v1077_v41 = vld [vmem:[#allocation10 + $0xe0] sm:$0xff] }
 0x25b   :  { %375 = vrot.lane.b32.xlu1 %v357_v30, %s3081_s28  ;;  %371 = vrot.lane.b32.xlu0 %v355_v31, %s3081_s28  ;;  %v732_v30 = vld [vmem:[#allocation14 + $0x40] sm:$0xff]  ;;  %v733_v31 = vld [vmem:[#allocation14 + $0x48] sm:$0xff] }
 0x25c   :  { %2625 = vmatpush3.bf16.msra.mxu1 %v3304_v42  ;;  %v2633_v32 = vpack.c.bf16 %v733_v31, %v732_v30  ;;  %v1452_v30 = vld [vmem:[#allocation11 + $0x68] sm:$0xff]  ;;  %v1078_v43 = vld [vmem:[#allocation10 + $0xe8] sm:$0xff] }
 0x25d   :  { %2626 = vmatprep.subr.bf16.mxu1 %v3078_v0 }
 0x25f   :  { %377 = vrot.lane.b32.xlu1 %v358_v35, %s3081_s28  ;;  %373 = vrot.lane.b32.xlu0 %v356_v36, %s3081_s28  ;;  %v735_v35 = vld [vmem:[#allocation14 + $0x58] sm:$0xff] }
 0x260   :  { %2628 = vmatpush3.bf16.msra.mxu1 %v3308_v45  ;;  %v2636_v36 = vpack.c.bf16 %v735_v35, %v734_v34  ;;  %v1073_v34 = vld [vmem:[#allocation10 + $0xc0] sm:$0xff]  ;;  %v1074_v35 = vld [vmem:[#allocation10 + $0xc8] sm:$0xff] }
 0x261   :  { %2629 = vmatprep.subr.bf16.mxu1 %v3078_v0 }
 0x2cd   :  { %v376_v46 = vpop.permute.xlu1 %375  ;;  %v372_v47 = vpop.permute.xlu0 %371 }
 0x2ce   :  { %386 = vst.msk [vmem:[#allocation3 + $0x19] sm:$0xff] %vm383_vm4, %v376_v46  ;;  %384 = vst.msk [vmem:[#allocation3 + $0x1] sm:$0xff] %vm383_vm4, %v372_v47 }
 0x2d1   :  { %v378_v48 = vpop.permute.xlu1 %377  ;;  %v374_v49 = vpop.permute.xlu0 %373 }
 0x2d2   :  { %387 = vst.msk [vmem:[#allocation3 + $0x21] sm:$0xff] %vm383_vm4, %v378_v48  ;;  %385 = vst.msk [vmem:[#allocation3 + $0x9] sm:$0xff] %vm383_vm4, %v374_v49 }
 0x2d5   :  { %v401_v50 = vld [vmem:[#allocation3 + $0x1] sm:$0xff]  ;;  %v403_v57 = vld [vmem:[#allocation3 + $0x19] sm:$0xff] }
 0x2d6   :  { %2294 = vmatprep.mubr.msk.f32.mxu0 %vm359_vm2, %v401_v50  ;;  %v388_v62 = vld [vmem:[#allocation3] sm:$0xff]  ;;  %v390_v16 = vld [vmem:[#allocation3 + $0x18] sm:$0xff] }
 0x2d9   :  { %v402_v54 = vld [vmem:[#allocation3 + $0x9] sm:$0xff]  ;;  %v404_v59 = vld [vmem:[#allocation3 + $0x21] sm:$0xff] }
 0x2da   :  { %2295 = vmatmul.mubr.msk.f32.vlgmr.msra.gmra.mrb[2].mxu0 %vm359_vm2, %v402_v54  ;;  %v389_v13 = vld [vmem:[#allocation3 + $0x8] sm:$0xff]  ;;  %v391_v18 = vld [vmem:[#allocation3 + $0x20] sm:$0xff] }
 0x2db   :  { %2591 = vmatpush3.bf16.msra.mxu0 %v2588_v29  ;;  %2297 = vmatprep.mubr.msk.f32.mxu0 %vm359_vm2, %v403_v57  ;;  %v609_v21 = vld [vmem:[#allocation3 + $0x2] sm:$0xff]  ;;  %v610_v24 = vld [vmem:[#allocation3 + $0xa] sm:$0xff]  ;;  %v611_v25 = vld [vmem:[#allocation3 + $0x1a] sm:$0xff]  ;;  %v2630_v29 = vpack.c.bf16 %v731_v28, %v730_v27 }
 0x2dc   :  { %2593 = vmatprep.subr.bf16.mxu0 %v2592_v53  ;;  %v612_v26 = vld [vmem:[#allocation3 + $0x22] sm:$0xff] }
 0x2dd   :  { %2631 = vmatpush3.bf16.msra.mxu1 %v2630_v29  ;;  %v1072_v27 = vld [vmem:[#allocation10 + $0xb8] sm:$0xff] }
 0x2de   :  { %2298 = vmatmul.mubr.msk.f32.gmra.mrb[4].mxu0 %vm359_vm2, %v404_v59  ;;  %2632 = vmatprep.subr.bf16.mxu1 %v3078_v0 }
 0x2df   :  { %2595 = vmatpush3.bf16.msra.mxu0 %v2592_v53  ;;  %2318 = vmatprep.mubr.msk.f32.mxu0 %vm359_vm2, %v388_v62 }
 0x2e0   :  { %2597 = vmatprep.subr.bf16.mxu0 %v2596_v58 }
 0x2e1   :  { %2634 = vmatpush3.bf16.msra.mxu1 %v2633_v32 }
 0x2e2   :  { %2635 = vmatprep.subr.bf16.mxu1 %v3078_v0 }
 0x2e3   :  { %2599 = vmatpush3.bf16.msra.mxu0 %v2596_v58 }
 0x2e4   :  { %2601 = vmatprep.subr.bf16.mxu0 %v2600_v63 }
 0x2e5   :  { %2637 = vmatpush3.bf16.msra.mxu1 %v2636_v36 }
 0x2e6   :  { %2638 = vmatprep.subr.bf16.mxu1 %v3078_v0 }
 0x2e7   :  { %2603 = vmatpush3.bf16.msra.mxu0 %v2600_v63 }
 0x2e8   :  { %2316 = vmatprep.subr.mxu0 %v400_v2 }
 0x2e9   :  { %2640 = vmatpush3.bf16.msra.mxu1 %v2639_v39 }
 0x2ea   :  { %2641 = vmatprep.subr.bf16.mxu1 %v3078_v0 }
 0x2eb   :  { %2317 = vmatpush3.msra.mxu0 %v400_v2 }
 0x2ec   :  { %2319 = vmatmul.mubr.msk.f32.vlgmr.msra.gmra.mrb[2].mxu0 %vm359_vm2, %v389_v13  ;;  %2605 = vmatprep.subr.bf16.mxu0 %v2604_v8 }
 0x2ed   :  { %2321 = vmatprep.mubr.msk.f32.mxu0 %vm359_vm2, %v390_v16  ;;  %2607 = vmatpush3.bf16.msra.mxu0 %v2604_v8 }
 0x2ee   :  { %2609 = vmatprep.subr.bf16.mxu0 %v2608_v12  ;;  %2643 = vmatpush3.bf16.msra.mxu1 %v2642_v44 }
 0x2ef   :  { %2644 = vmatprep.subr.bf16.mxu1 %v3078_v0 }
 0x2f0   :  { %2322 = vmatmul.mubr.msk.f32.gmra.mrb[4].mxu0 %vm359_vm2, %v391_v18  ;;  %v1067_v18 = vld [vmem:[#allocation10 + $0x90] sm:$0xff] }
 0x2f1   :  { %2611 = vmatpush3.bf16.msra.mxu0 %v2608_v12  ;;  %2342 = vmatprep.mubr.msk.f32.mxu0 %vm359_vm2, %v609_v21  ;;  %v2669_v21 = vpack.c.bf16 %v1068_v19, %v1067_v18  ;;  %v1435_v19 = vld [vmem:[#allocation11 + $0x8] sm:$0xff] }
 0x2f2   :  { %2613 = vmatprep.subr.bf16.mxu0 %v2612_v17 }
 0x2f5   :  { %2615 = vmatpush3.bf16.msra.mxu0 %v2612_v17 }
 0x2f6   :  { %2617 = vmatprep.subr.bf16.mxu0 %v2616_v22 }
 0x2f9   :  { %2619 = vmatpush3.bf16.msra.mxu0 %v2616_v22  ;;  %v1070_v22 = vld [vmem:[#allocation10 + $0xa8] sm:$0xff] }
 0x2fa   :  { %2340 = vmatprep.subr.mxu0 %v622_v23 }
 0x2fd   :  { %2341 = vmatpush3.msra.mxu0 %v622_v23  ;;  %v1449_v23 = vld [vmem:[#allocation11 + $0x50] sm:$0xff] }
 0x2fe   :  { %2343 = vmatmul.mubr.msk.f32.vlgmr.msra.gmra.mrb[2].mxu0 %vm359_vm2, %v610_v24  ;;  %2668 = vmatprep.subr.bf16.mxu0 %v3078_v0  ;;  %v2672_v24 = vpack.c.bf16 %v1070_v22, %v1069_v20 }
 0x2ff   :  { %2345 = vmatprep.mubr.msk.f32.mxu0 %vm359_vm2, %v611_v25  ;;  %2670 = vmatpush1.bf16.msra.mxu0 %v2669_v21  ;;  %v1071_v25 = vld [vmem:[#allocation10 + $0xb0] sm:$0xff] }
 0x300   :  { %2671 = vmatprep.subr.bf16.mxu0 %v3078_v0 }
 0x302   :  { %2346 = vmatmul.mubr.msk.f32.gmra.mrb[4].mxu0 %vm359_vm2, %v612_v26  ;;  %v1450_v26 = vld [vmem:[#allocation11 + $0x58] sm:$0xff]  ;;  %vm1289_vm2 = vcmask 1045504  }
 0x303   :  { %v2749_v28 = vpack.c.bf16 %v1450_v26, %v1449_v23  ;;  %2673 = vmatpush1.bf16.msra.mxu0 %v2672_v24 }
 0x304   :  { %2674 = vmatprep.subr.bf16.mxu0 %v3078_v0 }
 0x3d1   :  { %v2344_v46 = vpop.f32.mrb[2].mxu0 }
 0x3d2   :  { %v701_v47 = vpop.f32.mrb[3].mxu0 }
 0x3d3   :  { %v742_v48 = vadd.f32 %v2344_v46, %v701_v47 }
 0x3d5   :  { %v2347_v49 = vpop.f32.mrb[4].mxu0 }
 0x3d6   :  { %v711_v50 = vpop.f32.mrb[5].mxu0 }
 0x3d7   :  { %v743_v51 = vadd.f32 %v742_v48, %v711_v50 }
 0x3d9   :  { %v744_v52 = vadd.f32 %v2347_v49, %v743_v51  ;;  %v1454_v51 = vld [vmem:[#allocation11 + $0x78] sm:$0xff] }
 0x3db   :  { %v745_v53 = vrot.slane %v744_v52, 4 }
 0x3dd   :  { %v746_v54 = vadd.f32 %v745_v53, %v744_v52  ;;  %v1079_v53 = vld [vmem:[#allocation10 + $0xf0] sm:$0xff] }
 0x3df   :  { %v747_v55 = vrot.slane %v746_v54, 2 }
 0x3e1   :  { %v748_v56 = vadd.f32 %v747_v55, %v746_v54  ;;  %v1080_v54 = vld [vmem:[#allocation10 + $0xf8] sm:$0xff] }
 0x3e3   :  { %v749_v57 = vrot.slane %v748_v56, 1 }
 0x3e5   :  { %v750_v58 = vadd.f32 %v749_v57, %v748_v56  ;;  %v2687_v56 = vpack.c.bf16 %v1080_v54, %v1079_v53  ;;  %v1005_v54 = vld [vmem:[#allocation10 + $0x10] sm:$0xff] }
 0x3e7   :  { %2381 = vmatmul.mubr.f32.vlgmr.msra.gmra.mrb[2].mxu1 %v750_v58  ;;  %v1455_v58 = vld [vmem:[#allocation11 + $0x80] sm:$0xff] }
 0x3e8   :  { %2646 = vmatpush3.bf16.msra.mxu1 %v3301_v40  ;;  %2415 = vmatprep.mubr.msk.f32.mxu1 %vm3079_vm0, %v3080_v1  ;;  %vm985_vm0 = vcmask 1040448  }
 0x3e9   :  { %2647 = vmatprep.subr.bf16.mxu1 %v3078_v0 }
 0x3ec   :  { %2649 = vmatpush3.bf16.msra.mxu1 %v3304_v42 }
 0x3ed   :  { %2650 = vmatprep.subr.bf16.mxu1 %v3078_v0 }
 0x3f0   :  { %2652 = vmatpush3.bf16.msra.mxu1 %v3308_v45 }
 0x3f1   :  { %2653 = vmatprep.subr.bf16.mxu1 %v3078_v0 }
 0x3f4   :  { %2655 = vmatpush3.bf16.msra.mxu1 %v2630_v29  ;;  %v1451_v29 = vld [vmem:[#allocation11 + $0x60] sm:$0xff] }
 0x3f5   :  { %2656 = vmatprep.subr.bf16.mxu1 %v3078_v0  ;;  %v2753_v31 = vpack.c.bf16 %v1452_v30, %v1451_v29  ;;  %v1003_v30 = vld [vmem:[#allocation10] sm:$0xff] }
 0x3f8   :  { %2658 = vmatpush3.bf16.msra.mxu1 %v2633_v32  ;;  %v2675_v32 = vpack.c.bf16 %v1072_v27, %v1071_v25 }
 0x3f9   :  { %2659 = vmatprep.subr.bf16.mxu1 %v3078_v0 }
 0x3fa   :  { %2676 = vmatpush1.bf16.msra.mxu0 %v2675_v32 }
 0x3fb   :  { %2677 = vmatprep.subr.bf16.mxu0 %v3078_v0 }
 0x3fc   :  { %2661 = vmatpush3.bf16.msra.mxu1 %v2636_v36  ;;  %v2678_v36 = vpack.c.bf16 %v1074_v35, %v1073_v34 }
 0x3fd   :  { %2662 = vmatprep.subr.bf16.mxu1 %v3078_v0 }
 0x3fe   :  { %2679 = vmatpush1.bf16.msra.mxu0 %v2678_v36  ;;  %v1436_v36 = vld [vmem:[#allocation11 + $0x10] sm:$0xff] }
 0x3ff   :  { %2680 = vmatprep.subr.bf16.mxu0 %v3078_v0 }
 0x400   :  { %2664 = vmatpush3.bf16.msra.mxu1 %v2639_v39  ;;  %v2681_v39 = vpack.c.bf16 %v1076_v38, %v1075_v37 }
 0x401   :  { %2665 = vmatprep.subr.bf16.mxu1 %v3078_v0 }
 0x402   :  { %2682 = vmatpush1.bf16.msra.mxu0 %v2681_v39 }
 0x403   :  { %2683 = vmatprep.subr.bf16.mxu0 %v3078_v0 }
 0x404   :  { %2667 = vmatpush3.bf16.msra.mxu1 %v2642_v44  ;;  %v2684_v44 = vpack.c.bf16 %v1078_v43, %v1077_v41 }
 0x405   :  { %2750 = vmatprep.subr.bf16.mxu1 %v2749_v28 }
 0x406   :  { %2685 = vmatpush1.bf16.msra.mxu0 %v2684_v44  ;;  %v1437_v44 = vld [vmem:[#allocation11 + $0x18] sm:$0xff] }
 0x407   :  { %2686 = vmatprep.subr.bf16.mxu0 %v3078_v0  ;;  %v2773_v53 = vpack.c.bf16 %v1437_v44, %v1436_v36  ;;  %v1013_v44 = vld [vmem:[#allocation10 + $0x50] sm:$0xff] }
 0x40a   :  { %2688 = vmatpush1.bf16.msra.mxu0 %v2687_v56 }
 0x40b   :  { %2689 = vmatprep.subr.bf16.mxu0 %v3078_v0 }
 0x4ba   :  { %v817_v40 = vpop.f32.mrb[2].mxu1 }
 0x4bb   :  { %v824_v42 = vrot.slane %v817_v40, %v3270_v33  ;;  %v2382_v59 = vpop.f32.mrb[3].mxu1  ;;  %v1456_v40 = vld [vmem:[#allocation11 + $0x88] sm:$0xff] }
 0x4bc   :  { %v2761_v59 = vpack.c.bf16 %v1456_v40, %v1455_v58  ;;  %v1438_v58 = vld [vmem:[#allocation11 + $0x20] sm:$0xff]  ;;  %v1439_v40 = vld [vmem:[#allocation11 + $0x28] sm:$0xff] }
 0x4bd   :  { %v3344_v45 = vsub.f32 %v701_v47, %v824_v42  ;;  %v3346_v60 = vsub.f32 %v2344_v46, %v824_v42  ;;  %v3348_v61 = vsub.f32 %v711_v50, %v824_v42  ;;  %v3350_v62 = vsub.f32 %v2347_v49, %v824_v42  ;;  %v740_v49 = vld [vmem:[%s3554_s6 + $0x2] sm:$0x1]  ;;  %v1453_v50 = vld [vmem:[#allocation11 + $0x70] sm:$0xff] }
 0x4be   :  { %v2757_v52 = vpack.c.bf16 %v1454_v51, %v1453_v50 }
 0x4bf   :  { %v829_v63 = vmul.f32 %v3344_v45, %v3344_v45  ;;  %v830_v2 = vmul.f32 %v3346_v60, %v3346_v60  ;;  %v831_v3 = vmul.f32 %v3348_v61, %v3348_v61  ;;  %v832_v5 = vmul.f32 %v3350_v62, %v3350_v62 }
 0x4c1   :  { %v833_v4 = vadd.f32 %v830_v2, %v829_v63  ;;  %v1081_v63 = vld [vmem:[#allocation10 + $0x100] sm:$0xff]  ;;  %v1082_v2 = vld [vmem:[#allocation10 + $0x108] sm:$0xff] }
 0x4c3   :  { %v834_v6 = vadd.f32 %v833_v4, %v831_v3  ;;  %v2044_v3 = vld [vmem:[%s3554_s6 + $0x3] ss:$0 sm:$0xff]  ;;  %v2690_v4 = vpack.c.bf16 %v1082_v2, %v1081_v63  ;;  %v1007_v2 = vld [vmem:[#allocation10 + $0x20] sm:$0xff]  ;;  %s3082_s6 = smov [#allocation16]  }
 0x4c4   :  { %s2014_s11 = sshll.u32 %s3082_s6, 4  ;;  %s2015_s11 = int_to_ptr.vmem [resolvable:$true] %s2014_s11 }
 0x4c5   :  { %v835_v8 = vadd.f32 %v834_v6, %v832_v5  ;;  %2691 = vmatpush1.bf16.msra.mxu0 %v2690_v4  ;;  %s3038_s12 = scalar_lea.vmem %s2015_s11, 512  ;;  %p3043_p7 = scmp.lt.s32.totalorder %s2015_s11, %s2015_s11 }
 0x4c6   :  { %2692 = vmatprep.subr.bf16.mxu0 %v3078_v0  ;;  %p3039_p6 = scmp.ne.s32.totalorder %s2015_s11, %s3038_s12  ;;  %p3044_p8 = scmp.lt.s32.totalorder %s3038_s12, %s3038_s12 }
 0x4c7   :  { %v836_v12 = vrot.slane %v835_v8, 4 }
 0x4c8   :  { %p3045_p9 = por %p3044_p8, %p3043_p7 }
 0x4c9   :  { %v837_v13 = vadd.f32 %v836_v12, %v835_v8  ;;  %v1458_v8 = vld [vmem:[#allocation11 + $0x98] sm:$0xff] }
 0x4ca   :  { %p3046_p10 = pnand %p3045_p9, %p3039_p6 }
 0x4cb   :  { %v838_v14 = vrot.slane %v837_v13, 2 }
 0x4cd   :  { %v839_v15 = vadd.f32 %v838_v14, %v837_v13  ;;  %v1083_v14 = vld [vmem:[#allocation10 + $0x110] sm:$0xff] }
 0x4cf   :  { %v840_v16 = vrot.slane %v839_v15, 1 }
 0x4d1   :  { %v841_v17 = vadd.f32 %v840_v16, %v839_v15  ;;  %v1084_v15 = vld [vmem:[#allocation10 + $0x118] sm:$0xff] }
 0x4d3   :  { %2416 = vmatmul.mubr.f32.vlgmr.msra.gmra.mrb[4].mxu1 %v841_v17  ;;  %v2693_v17 = vpack.c.bf16 %v1084_v15, %v1083_v14  ;;  %v1009_v14 = vld [vmem:[#allocation10 + $0x30] sm:$0xff] }
 0x4d4   :  { %2752 = vmatpush3.bf16.msra.mxu1 %v2749_v28 }
 0x4d5   :  { %2754 = vmatprep.subr.bf16.mxu1 %v2753_v31  ;;  %2694 = vmatpush1.bf16.msra.mxu0 %v2693_v17  ;;  %v1010_v17 = vld [vmem:[#allocation10 + $0x38] sm:$0xff] }
 0x4d6   :  { %2695 = vmatprep.subr.bf16.mxu0 %v3078_v0 }
 0x4d8   :  { %2756 = vmatpush3.bf16.msra.mxu1 %v2753_v31  ;;  %v1004_v31 = vld [vmem:[#allocation10 + $0x8] sm:$0xff] }
 0x4d9   :  { %2758 = vmatprep.subr.bf16.mxu1 %v2757_v52 }
 0x4dc   :  { %2760 = vmatpush3.bf16.msra.mxu1 %v2757_v52 }
 0x4dd   :  { %2762 = vmatprep.subr.bf16.mxu1 %v2761_v59 }
 0x4e0   :  { %2764 = vmatpush3.bf16.msra.mxu1 %v2761_v59 }
 0x5a6   :  { %v908_v46 = vpop.f32.mrb[4].mxu1 }
 0x5a7   :  { %v909_v47 = vadd.f32 1e-05, %v908_v46  ;;  %v2417_v48 = vpop.f32.mrb[5].mxu1 }
 0x5a8   :  { %v2696_v48 = vpack.c.bf16 %v1004_v31, %v1003_v30 }
 0x5a9   :  { %2904 = vrsqrt.f32 %v909_v47 }
 0x5b3   :  { %v2905_v55 = vpop.eup %2904 }
 0x5b4   :  { %v913_v57 = vmul.f32 %v2905_v55, %v740_v49  ;;  %v1006_v55 = vld [vmem:[#allocation10 + $0x18] sm:$0xff] }
 0x5b6   :  { %v917_v42 = vrot.slane %v913_v57, %v3270_v33  ;;  %v1457_v33 = vld [vmem:[#allocation11 + $0x90] sm:$0xff] }
 0x5b7   :  { %v2765_v16 = vpack.c.bf16 %v1458_v8, %v1457_v33  ;;  %v1440_v33 = vld [vmem:[#allocation11 + $0x30] sm:$0xff]  ;;  %v1441_v8 = vld [vmem:[#allocation11 + $0x38] sm:$0xff] }
 0x5b8   :  { %v918_v5 = vmul.f32 %v917_v42, %v3344_v45  ;;  %v919_v6 = vmul.f32 %v917_v42, %v3346_v60  ;;  %v1434_v60 = vld [vmem:[#allocation11] sm:$0xff]  ;;  %v920_v22 = vmul.f32 %v917_v42, %v3348_v61  ;;  %v921_v23 = vmul.f32 %v917_v42, %v3350_v62 }
 0x5b9   :  { %2766 = vmatprep.subr.bf16.mxu1 %v2765_v16  ;;  %v3400_v24 = vpack.c.bf16 %v1435_v19, %v1434_v60  ;;  %v2699_v42 = vpack.c.bf16 %v1006_v55, %v1005_v54  ;;  %v2781_v60 = vpack.c.bf16 %v1441_v8, %v1440_v33  ;;  %v1019_v33 = vld [vmem:[#allocation10 + $0x80] sm:$0xff]  ;;  %v1020_v8 = vld [vmem:[#allocation10 + $0x88] sm:$0xff] }
 0x5ba   :  { %v926_v12 = vadd.f32 %v2044_v3, %v918_v5  ;;  %v927_v13 = vadd.f32 %v2044_v3, %v919_v6  ;;  %2768 = vmatpush3.bf16.msra.mxu1 %v2765_v16  ;;  %v928_v26 = vadd.f32 %v2044_v3, %v920_v22  ;;  %v929_v27 = vadd.f32 %v2044_v3, %v921_v23  ;;  %v1008_v3 = vld [vmem:[#allocation10 + $0x28] sm:$0xff]  ;;  %v1443_v22 = vld [vmem:[#allocation11 + $0x48] sm:$0xff] }
 0x5bb   :  { %2770 = vmatprep.subr.bf16.mxu1 %v3400_v24  ;;  %v2777_v6 = vpack.c.bf16 %v1439_v40, %v1438_v58  ;;  %v1663_v58 = vld [vmem:[#allocation11 + $0xc8] sm:$0xff] }
 0x5bc   :  { %v930_v45 = vmax.f32 %v926_v12, 0.0  ;;  %v931_v18 = vmax.f32 %v927_v13, 0.0  ;;  %v932_v1 = vmax.f32 %v928_v26, 0.0  ;;  %v933_v61 = vmax.f32 %v929_v27, 0.0  ;;  %v1011_v26 = vld [vmem:[#allocation10 + $0x40] sm:$0xff]  ;;  %v1012_v27 = vld [vmem:[#allocation10 + $0x48] sm:$0xff] }
 0x5bd   :  { %v2702_v13 = vpack.c.bf16 %v1008_v3, %v1007_v2  ;;  %v2708_v36 = vpack.c.bf16 %v1012_v27, %v1011_v26  ;;  %v1319_v27 = vld [vmem:[#allocation10 + $0x140] sm:$0xff] }
 0x5be   :  { %v953_v20 = vrot.slane %v930_v45, 7  ;;  %v954_v21 = vrot.slane %v931_v18, 7  ;;  %v956_v62 = vrot.slane %v932_v1, 7  ;;  %v957_v28 = vrot.slane %v933_v61, 7  ;;  %v1658_v1 = vld [vmem:[#allocation11 + $0xa0] sm:$0xff] }
 0x5c0   :  { %959 = vrot.lane.b32.xlu0 %v953_v20, %s3073_s14  ;;  %v955_v25 = vsel %vm952_vm8, %v953_v20, %v954_v21  ;;  %v958_v29 = vsel %vm952_vm8, %v956_v62, %v957_v28 }
 0x5c1   :  { %961 = vrot.lane.b32.xlu1 %v955_v25, %s3073_s14  ;;  %v2705_v25 = vpack.c.bf16 %v1010_v17, %v1009_v14  ;;  %v1667_v14 = vld [vmem:[#allocation11 + $0xe8] sm:$0xff]  ;;  %v1316_v17 = vld [vmem:[#allocation10 + $0x128] sm:$0xff] }
 0x5c4   :  { %125 = vrot.lane.b32.xlu0 %v3246_v7, %s3073_s14 }
 0x5c5   :  { %127 = vrot.lane.b32.xlu1 %v3248_v9, %s3073_s14 }
 0x5c8   :  { %129 = vrot.lane.b32.xlu0 %v3250_v10, %s3073_s14 }
 0x5c9   :  { %131 = vrot.lane.b32.xlu1 %v3252_v11, %s3073_s14 }
 0x5cc   :  { %963 = vrot.lane.b32.xlu0 %v954_v21, %s3073_s14  ;;  %v1442_v21 = vld [vmem:[#allocation11 + $0x40] sm:$0xff] }
 0x5cd   :  { %965 = vrot.lane.b32.xlu1 %v956_v62, %s3073_s14 }
 0x5d0   :  { %967 = vrot.lane.b32.xlu0 %v958_v29, %s3073_s14 }
 0x5d1   :  { %969 = vrot.lane.b32.xlu1 %v957_v28, %s3073_s14 }
 0x632   :  { %v960_v7 = vpop.permute.xlu0 %959 }
 0x633   :  { %978 = vst.msk [vmem:[#allocation4] sm:$0xfe] %vm977_vm10, %v960_v7  ;;  %v962_v9 = vpop.permute.xlu1 %961 }
 0x634   :  { %980 = vst.msk [vmem:[#allocation4 + $0x8] sm:$0xfe] %vm979_vm11, %v960_v7  ;;  %v1659_v7 = vld [vmem:[#allocation11 + $0xa8] sm:$0xff] }
 0x635   :  { %982 = vst.msk [vmem:[#allocation4 + $0x10] sm:$0xff] %vm981_vm12, %v962_v9 }
 0x636   :  { %984 = vst.msk [vmem:[#allocation4 + $0x18] sm:$0xff] %vm983_vm13, %v962_v9  ;;  %v126_v10 = vpop.permute.xlu0 %125 }
 0x637   :  { %138 = vst.msk [vmem:[#allocation2 + $0x2] sm:$0xff] %vm137_vm14, %v126_v10  ;;  %v128_v11 = vpop.permute.xlu1 %127 }
 0x638   :  { %139 = vst.msk [vmem:[#allocation2 + $0xa] sm:$0xff] %vm137_vm14, %v128_v11  ;;  %v2785_v11 = vpack.c.bf16 %v1443_v22, %v1442_v21  ;;  %v1317_v22 = vld [vmem:[#allocation10 + $0x130] sm:$0xff] }
 0x63a   :  { %v130_v32 = vpop.permute.xlu0 %129  ;;  %v1021_v35 = vld [vmem:[#allocation4] sm:$0xfe] }
 0x63b   :  { %v1022_v34 = vld [vmem:[#allocation4 + $0x8] sm:$0xfe]  ;;  %140 = vst.msk [vmem:[#allocation2 + $0x1a] sm:$0xff] %vm137_vm14, %v130_v32  ;;  %v132_v37 = vpop.permute.xlu1 %131  ;;  %v1042_v43 = vrot.slane %v1021_v35, 1 }
 0x63c   :  { %v1045_v39 = vrot.slane %v1022_v34, 1  ;;  %v3428_v41 = vld [vmem:[#allocation4 + $0x10] sm:$0xff]  ;;  %141 = vst.msk [vmem:[#allocation2 + $0x22] sm:$0xff] %vm137_vm14, %v132_v37  ;;  %v996_v54 = vld [vmem:[#allocation4 + $0x8] sm:$0xff] }
 0x63d   :  { %v3426_v38 = vld [vmem:[#allocation4 + $0x18] sm:$0xff]  ;;  %v1043_v47 = vrot.slane %v3428_v41, 1 }
 0x63e   :  { %v1046_v46 = vrot.slane %v3426_v38, 1  ;;  %v964_v49 = vpop.permute.xlu0 %963  ;;  %v1444_v51 = vld [vmem:[#allocation2 + $0x1] sm:$0xff] }
 0x63f   :  { %v1044_v52 = vsel %vm1041_vm15, %v1042_v43, %v1043_v47  ;;  %986 = vst.msk [vmem:[#allocation4 + $0x20] sm:$0x1] %vm985_vm0, %v964_v49  ;;  %2438 = vmatprep.mubr.msk.f32.mxu1 %vm113_vm6, %v1444_v51  ;;  %v966_v56 = vpop.permute.xlu1 %965  ;;  %v1445_v57 = vld [vmem:[#allocation2 + $0x9] sm:$0xff]  ;;  %v1430_v12 = vld [vmem:[#allocation2] sm:$0xff]  ;;  %v2789_v43 = vpack.c.bf16 %v1659_v7, %v1658_v1  ;;  %v1015_v51 = vld [vmem:[#allocation10 + $0x60] sm:$0xff] }
 0x640   :  { %v1047_v50 = vsel %vm1041_vm15, %v1045_v39, %v1046_v46  ;;  %988 = vst.msk [vmem:[#allocation4 + $0x28] sm:$0x1] %vm987_vm1, %v964_v49  ;;  %2439 = vmatmul.mubr.msk.f32.vlgmr.msra.gmra.mrb[6].mxu1 %vm113_vm6, %v1445_v57  ;;  %v1662_v57 = vld [vmem:[#allocation11 + $0xc0] sm:$0xff]  ;;  %v1320_v1 = vld [vmem:[#allocation10 + $0x148] sm:$0xff] }
 0x641   :  { %2045 = vmatprep.mubr.msk.f32.mxu0 %vm935_vm5, %v1047_v50  ;;  %989 = vst.msk [vmem:[#allocation4 + $0x30] sm:$0xfe] %vm977_vm10, %v966_v56  ;;  %2772 = vmatpush3.bf16.msra.mxu1 %v3400_v24  ;;  %v2797_v2 = vpack.c.bf16 %v1663_v58, %v1662_v57  ;;  %v1653_v3 = vld [vmem:[#allocation2 + $0x2] sm:$0xff]  ;;  %v1326_v57 = vld [vmem:[#allocation10 + $0x178] sm:$0xff] }
 0x642   :  { %990 = vst.msk [vmem:[#allocation4 + $0x38] sm:$0xfe] %vm979_vm11, %v966_v56  ;;  %1158 = vmatmul.mubr.f32.vlgmr.msra.gmra.mrb[6].mxu0 %v1044_v52  ;;  %v968_v59 = vpop.permute.xlu0 %967  ;;  %v1446_v63 = vld [vmem:[#allocation2 + $0x19] sm:$0xff]  ;;  %2774 = vmatprep.subr.bf16.mxu1 %v2773_v53 }
 0x643   :  { %2697 = vmatpush1.bf16.msra.mxu0 %v2696_v48  ;;  %991 = vst.msk [vmem:[#allocation4 + $0x40] sm:$0xff] %vm981_vm12, %v968_v59  ;;  %2441 = vmatprep.mubr.msk.f32.mxu1 %vm113_vm6, %v1446_v63  ;;  %v970_v4 = vpop.permute.xlu1 %969  ;;  %v1447_v5 = vld [vmem:[#allocation2 + $0x21] sm:$0xff]  ;;  %v1432_v56 = vld [vmem:[#allocation2 + $0x18] sm:$0xff] }
 0x644   :  { %2698 = vmatprep.subr.bf16.mxu0 %v3078_v0  ;;  %992 = vst.msk [vmem:[#allocation4 + $0x48] sm:$0xff] %vm983_vm13, %v968_v59  ;;  %2442 = vmatmul.mubr.msk.f32.gmra.mrb[8].mxu1 %vm113_vm6, %v1447_v5  ;;  %v1661_v48 = vld [vmem:[#allocation11 + $0xb8] sm:$0xff]  ;;  %v1018_v59 = vld [vmem:[#allocation10 + $0x78] sm:$0xff] }
 0x645   :  { %993 = vst.msk [vmem:[#allocation4 + $0x50] sm:$0x1] %vm985_vm0, %v970_v4  ;;  %2776 = vmatpush3.bf16.msra.mxu1 %v2773_v53  ;;  %2464 = vmatprep.mubr.msk.f32.mxu1 %vm113_vm6, %v1430_v12  ;;  %v1016_v52 = vld [vmem:[#allocation10 + $0x68] sm:$0xff]  ;;  %v1431_v53 = vld [vmem:[#allocation2 + $0x8] sm:$0xff] }
 0x646   :  { %994 = vst.msk [vmem:[#allocation4 + $0x58] sm:$0x1] %vm987_vm1, %v970_v4  ;;  %v1023_v16 = vld [vmem:[#allocation4 + $0x20] sm:$0x1]  ;;  %2778 = vmatprep.subr.bf16.mxu1 %v2777_v6  ;;  %v2714_v40 = vpack.c.bf16 %v1016_v52, %v1015_v51  ;;  %v1664_v4 = vld [vmem:[#allocation11 + $0xd0] sm:$0xff] }
 0x647   :  { %2700 = vmatpush1.bf16.msra.mxu0 %v2699_v42  ;;  %v1024_v15 = vld [vmem:[#allocation4 + $0x28] sm:$0x1]  ;;  %v1048_v18 = vrot.slane %v1023_v16, 1  ;;  %v1433_v63 = vld [vmem:[#allocation2 + $0x20] sm:$0xff]  ;;  %v1315_v16 = vld [vmem:[#allocation10 + $0x120] sm:$0xff] }
 0x648   :  { %2701 = vmatprep.subr.bf16.mxu0 %v3078_v0  ;;  %v1050_v45 = vrot.slane %v1024_v15, 1  ;;  %v1025_v20 = vld [vmem:[#allocation4 + $0x30] sm:$0xfe]  ;;  %v1017_v42 = vld [vmem:[#allocation10 + $0x70] sm:$0xff]  ;;  %v1665_v5 = vld [vmem:[#allocation11 + $0xd8] sm:$0xff]  ;;  %v2720_v15 = vpack.c.bf16 %v1020_v8, %v1019_v33 }
 0x649   :  { %v1026_v19 = vld [vmem:[#allocation4 + $0x38] sm:$0xfe]  ;;  %2780 = vmatpush3.bf16.msra.mxu1 %v2777_v6  ;;  %v1049_v24 = vsel %vm1041_vm15, %v1043_v47, %v1048_v18  ;;  %v1052_v29 = vrot.slane %v1025_v20, 1  ;;  %v2717_v6 = vpack.c.bf16 %v1018_v59, %v1017_v42  ;;  %v2801_v12 = vpack.c.bf16 %v1665_v5, %v1664_v4  ;;  %v995_v20 = vld [vmem:[#allocation4] sm:$0xff]  ;;  %v1891_v42 = vld [vmem:[#allocation11 + $0x148] sm:$0xff] }
 0x64a   :  { %v1051_v23 = vsel %vm1041_vm15, %v1046_v46, %v1050_v45  ;;  %v1055_v62 = vrot.slane %v1026_v19, 1  ;;  %v3466_v28 = vld [vmem:[#allocation4 + $0x40] sm:$0xff]  ;;  %2782 = vmatprep.subr.bf16.mxu1 %v2781_v60  ;;  %v1014_v46 = vld [vmem:[#allocation10 + $0x58] sm:$0xff]  ;;  %v1660_v47 = vld [vmem:[#allocation11 + $0xb0] sm:$0xff]  ;;  %v2723_v19 = vpack.c.bf16 %v1316_v17, %v1315_v16 }
 0x64b   :  { %2703 = vmatpush1.bf16.msra.mxu0 %v2702_v13  ;;  %2046 = vmatprep.mubr.msk.f32.mxu0 %vm935_vm5, %v1051_v23  ;;  %v3464_v61 = vld [vmem:[#allocation4 + $0x48] sm:$0xff]  ;;  %v1053_v10 = vrot.slane %v3466_v28, 1  ;;  %v2711_v49 = vpack.c.bf16 %v1014_v46, %v1013_v44  ;;  %v2793_v55 = vpack.c.bf16 %v1661_v48, %v1660_v47  ;;  %v1774_v18 = vld [vmem:[#allocation11 + $0xf0] sm:$0xff]  ;;  %v1318_v23 = vld [vmem:[#allocation10 + $0x138] sm:$0xff] }
 0x64c   :  { %2704 = vmatprep.subr.bf16.mxu0 %v3078_v0  ;;  %1163 = vmatmul.mubr.f32.gmra.mrb[8].mxu0 %v1049_v24  ;;  %v1056_v9 = vrot.slane %v3464_v61, 1  ;;  %v1027_v31 = vld [vmem:[#allocation4 + $0x50] sm:$0x1]  ;;  %v1666_v13 = vld [vmem:[#allocation11 + $0xe0] sm:$0xff]  ;;  %v2726_v26 = vpack.c.bf16 %v1318_v23, %v1317_v22  ;;  %v1892_v4 = vld [vmem:[#allocation11 + $0x150] sm:$0xff] }
 0x64d   :  { %v1028_v30 = vld [vmem:[#allocation4 + $0x58] sm:$0x1]  ;;  %2784 = vmatpush3.bf16.msra.mxu1 %v2781_v60  ;;  %v1054_v35 = vsel %vm1041_vm15, %v1052_v29, %v1053_v10  ;;  %v1058_v39 = vrot.slane %v1027_v31, 1  ;;  %v2805_v45 = vpack.c.bf16 %v1667_v14, %v1666_v13  ;;  %v1775_v60 = vld [vmem:[#allocation11 + $0xf8] sm:$0xff]  ;;  %v1776_v24 = vld [vmem:[#allocation11 + $0x100] sm:$0xff]  ;;  %v2729_v31 = vpack.c.bf16 %v1320_v1, %v1319_v27 }
 0x64e   :  { %v1060_v32 = vrot.slane %v1028_v30, 1  ;;  %v1057_v34 = vsel %vm1041_vm15, %v1055_v62, %v1056_v9  ;;  %2786 = vmatprep.subr.bf16.mxu1 %v2785_v11  ;;  %v2809_v21 = vpack.c.bf16 %v1775_v60, %v1774_v18  ;;  %v1654_v62 = vld [vmem:[#allocation2 + $0xa] sm:$0xff]  ;;  %v1000_v29 = vld [vmem:[#allocation4 + $0x38] sm:$0xff]  ;;  %v1893_v5 = vld [vmem:[#allocation11 + $0x158] sm:$0xff]  ;;  %v1291_v27 = vrot.slane %v3428_v41, 2 }
 0x64f   :  { %2706 = vmatpush1.bf16.msra.mxu0 %v2705_v25  ;;  %2047 = vmatprep.mubr.msk.f32.mxu0 %vm935_vm5, %v1057_v34  ;;  %v1059_v50 = vsel %vm1041_vm15, %v1053_v10, %v1058_v39  ;;  %v1777_v25 = vld [vmem:[#allocation11 + $0x108] sm:$0xff]  ;;  %v1655_v10 = vld [vmem:[#allocation2 + $0x1a] sm:$0xff]  ;;  %v1274_v30 = vld [vmem:[#allocation4 + $0x8] sm:$0xfc] }
 0x650   :  { %2707 = vmatprep.subr.bf16.mxu0 %v3078_v0  ;;  %v1061_v37 = vsel %vm1041_vm15, %v1056_v9, %v1060_v32  ;;  %1168 = vmatmul.mubr.f32.gmra.mrb[10].mxu0 %v1054_v35  ;;  %v2813_v7 = vpack.c.bf16 %v1777_v25, %v1776_v24  ;;  %v1778_v9 = vld [vmem:[#allocation11 + $0x110] sm:$0xff]  ;;  %v999_v32 = vld [vmem:[#allocation4 + $0x30] sm:$0xff]  ;;  %v1321_v34 = vld [vmem:[#allocation10 + $0x150] sm:$0xff]  ;;  %v1293_v39 = vrot.slane %v1274_v30, 2 }
 0x651   :  { %2048 = vmatprep.mubr.msk.f32.mxu0 %vm935_vm5, %v1061_v37  ;;  %2788 = vmatpush3.bf16.msra.mxu1 %v2785_v11  ;;  %v1779_v11 = vld [vmem:[#allocation11 + $0x118] sm:$0xff]  ;;  %v1322_v35 = vld [vmem:[#allocation10 + $0x158] sm:$0xff]  ;;  %v1780_v46 = vld [vmem:[#allocation11 + $0x120] sm:$0xff] }
 0x652   :  { %2790 = vmatprep.subr.bf16.mxu1 %v2789_v43  ;;  %v2817_v37 = vpack.c.bf16 %v1779_v11, %v1778_v9  ;;  %v1769_v44 = vld [vmem:[#allocation2 + $0x3] sm:$0xff]  ;;  %v1781_v47 = vld [vmem:[#allocation11 + $0x128] sm:$0xff]  ;;  %v2732_v48 = vpack.c.bf16 %v1322_v35, %v1321_v34  ;;  %v1771_v16 = vld [vmem:[#allocation2 + $0x1b] sm:$0xff] }
 0x653   :  { %2709 = vmatpush1.bf16.msra.mxu0 %v2708_v36  ;;  %v1656_v36 = vld [vmem:[#allocation2 + $0x22] sm:$0xff]  ;;  %v2821_v52 = vpack.c.bf16 %v1781_v47, %v1780_v46  ;;  %v1330_v8 = vld [vmem:[#allocation10 + $0x198] sm:$0xff] }
 0x654   :  { %2710 = vmatprep.subr.bf16.mxu0 %v3078_v0  ;;  %1173 = vmatmul.mubr.f32.gmra.mrb[12].mxu0 %v1059_v50  ;;  %v1324_v50 = vld [vmem:[#allocation10 + $0x168] sm:$0xff]  ;;  %v1329_v33 = vld [vmem:[#allocation10 + $0x190] sm:$0xff]  ;;  %v1899_v9 = vld [vmem:[#allocation11 + $0x188] sm:$0xff] }
 0x655   :  { %2465 = vmatmul.mubr.msk.f32.vlgmr.msra.gmra.mrb[6].mxu1 %vm113_vm6, %v1431_v53  ;;  %2049 = vmatprep.mubr.msk.f32.mxu0 %vm935_vm5, %v996_v54  ;;  %v1782_v53 = vld [vmem:[#allocation11 + $0x130] sm:$0xff]  ;;  %v1783_v54 = vld [vmem:[#allocation11 + $0x138] sm:$0xff]  ;;  %v1770_v13 = vld [vmem:[#allocation2 + $0xb] sm:$0xff]  ;;  %v2744_v17 = vpack.c.bf16 %v1330_v8, %v1329_v33 }
 0x656   :  { %2467 = vmatprep.mubr.msk.f32.mxu1 %vm113_vm6, %v1432_v56  ;;  %2792 = vmatpush3.bf16.msra.mxu1 %v2789_v43  ;;  %v1294_v43 = vrot.slane %v3426_v38, 2  ;;  %v1325_v56 = vld [vmem:[#allocation10 + $0x170] sm:$0xff]  ;;  %v2825_v58 = vpack.c.bf16 %v1783_v54, %v1782_v53  ;;  %v1332_v18 = vld [vmem:[#allocation10 + $0x1a8] sm:$0xff]  ;;  %v1277_v35 = vld [vmem:[#allocation4 + $0x30] sm:$0xfc] }
 0x657   :  { %2712 = vmatpush1.bf16.msra.mxu0 %v2711_v49  ;;  %2794 = vmatprep.subr.bf16.mxu1 %v2793_v55  ;;  %v1323_v49 = vld [vmem:[#allocation10 + $0x160] sm:$0xff]  ;;  %v2738_v59 = vpack.c.bf16 %v1326_v57, %v1325_v56  ;;  %v1894_v14 = vld [vmem:[#allocation11 + $0x160] sm:$0xff]  ;;  %v1897_v22 = vld [vmem:[#allocation11 + $0x178] sm:$0xff] }
 0x658   :  { %2713 = vmatprep.subr.bf16.mxu0 %v3078_v0  ;;  %v1295_v51 = vsel %vm1289_vm2, %v1293_v39, %v1294_v43  ;;  %v1885_v23 = vld [vmem:[#allocation2 + $0x4] sm:$0xff]  ;;  %v1886_v47 = vld [vmem:[#allocation2 + $0xc] sm:$0xff] }
 0x659   :  { %2468 = vmatmul.mubr.msk.f32.gmra.mrb[8].mxu1 %vm113_vm6, %v1433_v63  ;;  %v1327_v63 = vld [vmem:[#allocation10 + $0x180] sm:$0xff]  ;;  %v1276_v25 = vld [vmem:[#allocation4 + $0x28] sm:$0x3] }
 0x65a   :  { %2490 = vmatprep.mubr.msk.f32.mxu1 %vm113_vm6, %v1653_v3  ;;  %2796 = vmatpush3.bf16.msra.mxu1 %v2793_v55  ;;  %v2735_v55 = vpack.c.bf16 %v1324_v50, %v1323_v49  ;;  %v1888_v50 = vld [vmem:[#allocation2 + $0x24] sm:$0xff] }
 0x65b   :  { %2715 = vmatpush1.bf16.msra.mxu0 %v2714_v40  ;;  %2798 = vmatprep.subr.bf16.mxu1 %v2797_v2  ;;  %v1890_v40 = vld [vmem:[#allocation11 + $0x140] sm:$0xff] }
 0x65c   :  { %2716 = vmatprep.subr.bf16.mxu0 %v3078_v0  ;;  %v2829_v3 = vpack.c.bf16 %v1891_v42, %v1890_v40 }
 0x65e   :  { %2800 = vmatpush3.bf16.msra.mxu1 %v2797_v2  ;;  %v1328_v2 = vld [vmem:[#allocation10 + $0x188] sm:$0xff] }
 0x65f   :  { %2718 = vmatpush1.bf16.msra.mxu0 %v2717_v6  ;;  %2802 = vmatprep.subr.bf16.mxu1 %v2801_v12  ;;  %v2741_v6 = vpack.c.bf16 %v1328_v2, %v1327_v63 }
 0x660   :  { %2719 = vmatprep.subr.bf16.mxu0 %v3078_v0 }
 0x662   :  { %2804 = vmatpush3.bf16.msra.mxu1 %v2801_v12  ;;  %v2833_v12 = vpack.c.bf16 %v1893_v5, %v1892_v4 }
 0x663   :  { %2721 = vmatpush1.bf16.msra.mxu0 %v2720_v15  ;;  %2806 = vmatprep.subr.bf16.mxu1 %v2805_v45  ;;  %v1895_v15 = vld [vmem:[#allocation11 + $0x168] sm:$0xff] }
 0x664   :  { %2722 = vmatprep.subr.bf16.mxu0 %v3078_v0  ;;  %v2837_v60 = vpack.c.bf16 %v1895_v15, %v1894_v14 }
 0x666   :  { %1253 = vmatmul.mubr.f32.vlgmr.msra.gmra.mrb[6].mxu0 %v995_v20  ;;  %2808 = vmatpush3.bf16.msra.mxu1 %v2805_v45  ;;  %v1331_v45 = vld [vmem:[#allocation10 + $0x1a0] sm:$0xff]  ;;  %v1772_v20 = vld [vmem:[#allocation2 + $0x23] sm:$0xff] }
 0x667   :  { %2050 = vmatprep.mubr.msk.f32.mxu0 %vm935_vm5, %v3426_v38  ;;  %2724 = vmatpush1.bf16.msra.mxu0 %v2723_v19  ;;  %v1896_v19 = vld [vmem:[#allocation11 + $0x170] sm:$0xff]  ;;  %v2747_v24 = vpack.c.bf16 %v1332_v18, %v1331_v45  ;;  %v1279_v38 = vld [vmem:[#allocation4 + $0x50] sm:$0x3] }
 0x668   :  { %2725 = vmatprep.subr.bf16.mxu0 %v3078_v0  ;;  %2810 = vmatprep.subr.bf16.mxu1 %v2809_v21  ;;  %v2841_v1 = vpack.c.bf16 %v1897_v22, %v1896_v19  ;;  %v1306_v46 = vrot.slane %v1279_v38, 2 }
 0x669   :  { %2491 = vmatmul.mubr.msk.f32.vlgmr.msra.gmra.mrb[6].mxu1 %vm113_vm6, %v1654_v62  ;;  %v1298_v62 = vrot.slane %v1276_v25, 2 }
 0x66a   :  { %1258 = vmatmul.mubr.f32.gmra.mrb[8].mxu0 %v3428_v41  ;;  %2493 = vmatprep.mubr.msk.f32.mxu1 %vm113_vm6, %v1655_v10  ;;  %v1304_v41 = vrot.slane %v3464_v61, 2 }
 0x66b   :  { %2051 = vmatprep.mubr.msk.f32.mxu0 %vm935_vm5, %v1000_v29  ;;  %2727 = vmatpush1.bf16.msra.mxu0 %v2726_v26  ;;  %v1275_v29 = vld [vmem:[#allocation4 + $0x20] sm:$0x3] }
 0x66c   :  { %2812 = vmatpush3.bf16.msra.mxu1 %v2809_v21  ;;  %2728 = vmatprep.subr.bf16.mxu0 %v3078_v0  ;;  %v1273_v21 = vld [vmem:[#allocation4] sm:$0xfc]  ;;  %v1296_v11 = vrot.slane %v1275_v29, 2 }
 0x66d   :  { %2814 = vmatprep.subr.bf16.mxu1 %v2813_v7  ;;  %2494 = vmatmul.mubr.msk.f32.gmra.mrb[8].mxu1 %vm113_vm6, %v1656_v36  ;;  %v1290_v26 = vrot.slane %v1273_v21, 2 }
 0x66e   :  { %1263 = vmatmul.mubr.f32.gmra.mrb[10].mxu0 %v999_v32  ;;  %2516 = vmatprep.mubr.msk.f32.mxu1 %vm113_vm6, %v1769_v44  ;;  %v1280_v32 = vld [vmem:[#allocation4 + $0x58] sm:$0x3]  ;;  %v1297_v36 = vsel %vm1289_vm2, %v1291_v27, %v1296_v11 }
 0x66f   :  { %2052 = vmatprep.mubr.msk.f32.mxu0 %vm935_vm5, %v3464_v61  ;;  %2730 = vmatpush1.bf16.msra.mxu0 %v2729_v31  ;;  %v1292_v10 = vsel %vm1289_vm2, %v1290_v26, %v1291_v27  ;;  %v1278_v31 = vld [vmem:[#allocation4 + $0x38] sm:$0xfc]  ;;  %v1308_v44 = vrot.slane %v1280_v32, 2 }
 0x670   :  { %2816 = vmatpush3.bf16.msra.mxu1 %v2813_v7  ;;  %2731 = vmatprep.subr.bf16.mxu0 %v3078_v0  ;;  %v1898_v7 = vld [vmem:[#allocation11 + $0x180] sm:$0xff]  ;;  %v1303_v34 = vrot.slane %v1278_v31, 2 }
 0x671   :  { %2818 = vmatprep.subr.bf16.mxu1 %v2817_v37  ;;  %v2845_v30 = vpack.c.bf16 %v1899_v9, %v1898_v7 }
 0x672   :  { %1268 = vmatmul.mubr.f32.gmra.mrb[12].mxu0 %v3466_v28  ;;  %v1305_v39 = vsel %vm1289_vm2, %v1303_v34, %v1304_v41 }
 0x673   :  { %2053 = vmatprep.mubr.msk.f32.mxu0 %vm935_vm5, %v1295_v51  ;;  %2733 = vmatpush1.bf16.msra.mxu0 %v2732_v48  ;;  %v1309_v48 = vsel %vm1289_vm2, %v1304_v41, %v1308_v44 }
 0x674   :  { %2820 = vmatpush3.bf16.msra.mxu1 %v2817_v37  ;;  %2734 = vmatprep.subr.bf16.mxu0 %v3078_v0  ;;  %v1301_v37 = vrot.slane %v3466_v28, 2  ;;  %v1887_v28 = vld [vmem:[#allocation2 + $0x1c] sm:$0xff] }
 0x675   :  { %2822 = vmatprep.subr.bf16.mxu1 %v2821_v52 }
 0x676   :  { %v1307_v49 = vsel %vm1289_vm2, %v1301_v37, %v1306_v46 }
 0x677   :  { %2736 = vmatpush1.bf16.msra.mxu0 %v2735_v55 }
 0x678   :  { %2824 = vmatpush3.bf16.msra.mxu1 %v2821_v52  ;;  %2737 = vmatprep.subr.bf16.mxu0 %v3078_v0 }
 0x679   :  { %2826 = vmatprep.subr.bf16.mxu1 %v2825_v58 }
 0x67b   :  { %2739 = vmatpush1.bf16.msra.mxu0 %v2738_v59 }
 0x67c   :  { %2828 = vmatpush3.bf16.msra.mxu1 %v2825_v58  ;;  %2740 = vmatprep.subr.bf16.mxu0 %v3078_v0 }
 0x67d   :  { %2830 = vmatprep.subr.bf16.mxu1 %v2829_v3 }
 0x67f   :  { %2517 = vmatmul.mubr.msk.f32.vlgmr.msra.gmra.mrb[6].mxu1 %vm113_vm6, %v1770_v13  ;;  %2742 = vmatpush1.bf16.msra.mxu0 %v2741_v6 }
 0x680   :  { %2519 = vmatprep.mubr.msk.f32.mxu1 %vm113_vm6, %v1771_v16  ;;  %2832 = vmatpush3.bf16.msra.mxu1 %v2829_v3 }
 0x681   :  { %2743 = vmatprep.subr.bf16.mxu0 %v3078_v0  ;;  %2834 = vmatprep.subr.bf16.mxu1 %v2833_v12 }
 0x683   :  { %2520 = vmatmul.mubr.msk.f32.gmra.mrb[8].mxu1 %vm113_vm6, %v1772_v20  ;;  %2745 = vmatpush1.bf16.msra.mxu0 %v2744_v17 }
 0x684   :  { %2836 = vmatpush3.bf16.msra.mxu1 %v2833_v12  ;;  %2542 = vmatprep.mubr.msk.f32.mxu1 %vm113_vm6, %v1885_v23 }
 0x685   :  { %2746 = vmatprep.subr.bf16.mxu0 %v3078_v0  ;;  %2838 = vmatprep.subr.bf16.mxu1 %v2837_v60  ;;  %v1299_v0 = vsel %vm1289_vm2, %v1294_v43, %v1298_v62  ;;  %v1300_v43 = vrot.slane %v1277_v35, 2 }
 0x687   :  { %2748 = vmatpush1.bf16.msra.mxu0 %v2747_v24  ;;  %v1302_v61 = vsel %vm1289_vm2, %v1300_v43, %v1301_v37 }
 0x688   :  { %2840 = vmatpush3.bf16.msra.mxu1 %v2837_v60 }
 0x689   :  { %2842 = vmatprep.subr.bf16.mxu1 %v2841_v1 }
 0x68a   :  { %1406 = vmatmul.mubr.f32.vlgmr.msra.gmra.mrb[6].mxu0 %v1292_v10 }
 0x68b   :  { %2054 = vmatprep.mubr.msk.f32.mxu0 %vm935_vm5, %v1299_v0 }
 0x68c   :  { %2844 = vmatpush3.bf16.msra.mxu1 %v2841_v1 }
 0x68d   :  { %2846 = vmatprep.subr.bf16.mxu1 %v2845_v30 }
 0x68e   :  { %1411 = vmatmul.mubr.f32.gmra.mrb[8].mxu0 %v1297_v36 }
 0x68f   :  { %2055 = vmatprep.mubr.msk.f32.mxu0 %vm935_vm5, %v1305_v39 }
 0x690   :  { %2848 = vmatpush3.bf16.msra.mxu1 %v2845_v30 }
 0x692   :  { %1416 = vmatmul.mubr.f32.gmra.mrb[10].mxu0 %v1302_v61 }
 0x693   :  { %2543 = vmatmul.mubr.msk.f32.vlgmr.msra.gmra.mrb[6].mxu1 %vm113_vm6, %v1886_v47  ;;  %2056 = vmatprep.mubr.msk.f32.mxu0 %vm935_vm5, %v1309_v48 }
 0x694   :  { %2545 = vmatprep.mubr.msk.f32.mxu1 %vm113_vm6, %v1887_v28 }
 0x696   :  { %1421 = vmatmul.mubr.f32.gmra.mrb[12].mxu0 %v1307_v49 }
 0x697   :  { %2546 = vmatmul.mubr.msk.f32.gmra.mrb[8].mxu1 %vm113_vm6, %v1888_v50 }
 0x75d   :  { %v1407_v51 = vpop.f32.mrb[6].mxu0 }
 0x75e   :  { %v1409_v52 = vpop.f32.mrb[7].mxu0 }
 0x761   :  { %v1412_v53 = vpop.f32.mrb[8].mxu0 }
 0x762   :  { %v1414_v54 = vpop.f32.mrb[9].mxu0 }
 0x765   :  { %v1417_v55 = vpop.f32.mrb[10].mxu0 }
 0x766   :  { %v2544_v56 = vpop.f32.mrb[6].mxu1  ;;  %v1419_v57 = vpop.f32.mrb[11].mxu0 }
 0x767   :  { %v2002_v58 = vadd.f32 %v2544_v56, %v1412_v53  ;;  %v1978_v40 = vpop.f32.mrb[7].mxu1 }
 0x768   :  { %v2001_v42 = vadd.f32 %v1978_v40, %v1407_v51 }
 0x769   :  { %2006 = vst [vmem:[#allocation16 + $0x8] sm:$0xff] %v2002_v58  ;;  %v1422_v59 = vpop.f32.mrb[12].mxu0 }
 0x76a   :  { %2005 = vst [vmem:[#allocation16] sm:$0xff] %v2001_v42  ;;  %v2547_v63 = vpop.f32.mrb[8].mxu1  ;;  %v1424_v2 = vpop.f32.mrb[13].mxu0 }
 0x76b   :  { %v2004_v3 = vadd.f32 %v2547_v63, %v1422_v59  ;;  %v1988_v4 = vpop.f32.mrb[9].mxu1 }
 0x76c   :  { %v2003_v5 = vadd.f32 %v1988_v4, %v1417_v55 }
 0x76d   :  { %2008 = vst [vmem:[#allocation16 + $0x18] sm:$0xff] %v2004_v3 }
 0x76e   :  { %2007 = vst [vmem:[#allocation16 + $0x10] sm:$0xff] %v2003_v5 }
 0x76f   :  { %3049 = shalt.err (!%p3046_p10)
}
 0x770   :  { %s3050_s3 = scalar_lea.hbm %s3555_s7, 512 }
 0x771   :  { %p3051_p11 = scmp.ne.s32.totalorder %s3555_s7, %s3050_s3  ;;  %p3054_p12 = scmp.lt.u32.totalorder %s3050_s3, %s3555_s7 }
 0x773   :  { %p3056_p13 = pnand %p3054_p12, %p3051_p11 }
 0x775   :  { %3059 = shalt.err (!%p3056_p13)
}
 0x776   :  { %2020 = dma.vmem_to_hbm [thread:$0]  %s2015_s11, 512, %s3555_s7, [#allocation7], %s3072_s13, %s3072_s13, %s3073_s14  }
 0x777   :  { %3068 = dma.done.wait [#allocation7], 512  }
 0x778   :  { %3069 = vsyncadd [#allocation7], 4294966784 }
 0x779   :  { %2024 = vsyncpa [#allocation6], 1 }
 0x77a   :  { %2025 = vsyncpa [#allocation9], 1 }
 0x77b   :  { %2026 = vsyncpa [#allocation12], 1 }
 0x77c   :  { %2027 = vsyncpa [#allocation15], 1 }
 0x77d   :  { %2028 = vsyncpa [#allocation7], 1 }

</bundles_post_ra>
